<compile_context>
chip_gen: v7x
topology: tpu7x:2x2x1
jax: 0.10.0
libtpu: 0.0.40
codegen_flags: <defaults>
</compile_context>

<pallas_src>
import jax
import jax.numpy as jnp
from jax import lax
from jax.experimental import pallas as pl
from jax.experimental.pallas import tpu as pltpu


# ----------------------------------------------------------------------------
# Fused kernel: in-VMEM im2col -> matmul -> (+shift, ReLU) -> 3x3/2 maxpool.
# ----------------------------------------------------------------------------
def _stem_kernel(xph_ref, w_ref, shift_ref, o_ref, y_scr, rm_scr):
    # xph_ref : (1, 2, Hc+3, Wc, 7*Cin)   row-phase-split, column-tap-packed input
    # w_ref   : (49*Cin, Cout)            BN-scale-folded weights
    # shift_ref: (1, Cout)                BN shift
    # o_ref   : (1, Ho, Wo, Cout)         pooled output (channels-last)
    # y_scr   : (Hc, Wc, Cout)            conv+bn+relu result (VMEM only)
    # rm_scr  : (Ho, Wc, Cout)            row-direction pool partial
    _, _, hcp3, Wc, KC = xph_ref.shape
    Hc = hcp3 - 3
    Ho, Wo = Hc // 2, Wc // 2
    Cout = o_ref.shape[-1]

    # ---- im2col in VMEM: 7 row taps (ky), columns/channels pre-packed (21) --
    pieces = []
    for ky in range(7):
        p, a = ky % 2, ky // 2                       # padded row 2*(hc+a)+p
        pieces.append(xph_ref[0, p, a:a + Hc, :, :])  # (Hc, Wc, 21)
    patches = jnp.concatenate(pieces, axis=-1)        # (Hc, Wc, 147)
    patches = patches.reshape(Hc * Wc, 7 * KC)        # (Hc*Wc, 147)

    # ---- conv as one matmul, BN shift + ReLU epilogue -----------------------
    acc = jnp.dot(patches, w_ref[...], preferred_element_type=jnp.float32)
    y = jnp.maximum(acc + shift_ref[...], 0.0)        # (Hc*Wc, Cout)
    y_scr[...] = y.reshape(Hc, Wc, Cout)

    # ---- maxpool 3x3, stride 2, pad 1.  ReLU output >= 0, so padding with 0
    #      is equivalent to torch's -inf padding. ----------------------------
    # rows: out row i uses y rows 2i-1, 2i, 2i+1
    ev = y_scr[pl.ds(0, Ho, stride=2), :, :]          # y[2i]
    od = y_scr[pl.ds(1, Ho, stride=2), :, :]          # y[2i+1]
    od_up = jnp.concatenate(
        [jnp.zeros((1, Wc, Cout), od.dtype), od[:Ho - 1]], axis=0)  # y[2i-1]
    rm_scr[...] = jnp.maximum(jnp.maximum(ev, od), od_up)           # (Ho, Wc, C)

    # cols: out col j uses rowmax cols 2j-1, 2j, 2j+1
    evc = rm_scr[:, pl.ds(0, Wo, stride=2), :]
    odc = rm_scr[:, pl.ds(1, Wo, stride=2), :]
    odc_l = jnp.concatenate(
        [jnp.zeros((Ho, 1, Cout), odc.dtype), odc[:, :Wo - 1, :]], axis=1)
    o_ref[0] = jnp.maximum(jnp.maximum(evc, odc), odc_l)


def _stem_pallas(xph, w_mat, shift, Hc, Wc, Ho, Wo, Cout):
    N = xph.shape[0]
    Kc = xph.shape[-1]                 # 7*Cin (column taps x input channels)
    return pl.pallas_call(
        _stem_kernel,
        out_shape=jax.ShapeDtypeStruct((N, Ho, Wo, Cout), jnp.float32),
        grid=(N,),
        in_specs=[
            pl.BlockSpec((1, 2, Hc + 3, Wc, Kc), lambda n: (n, 0, 0, 0, 0)),
            pl.BlockSpec((7 * Kc, Cout), lambda n: (0, 0)),
            pl.BlockSpec((1, Cout), lambda n: (0, 0)),
        ],
        out_specs=pl.BlockSpec((1, Ho, Wo, Cout), lambda n: (n, 0, 0, 0)),
        scratch_shapes=[
            pltpu.VMEM((Hc, Wc, Cout), jnp.float32),
            pltpu.VMEM((Ho, Wc, Cout), jnp.float32),
        ],
        compiler_params=pltpu.CompilerParams(dimension_semantics=("parallel",)),
    )(xph, w_mat, shift)


# ----------------------------------------------------------------------------
# Wrapper: cheap layout glue only (no im2col / window inflation in HBM).
# ----------------------------------------------------------------------------
def visible_module_forward(x, w, gamma, beta, r_mean, r_var, eps=1e-5):
    N, Cin, H, W = x.shape
    Cout = w.shape[0]
    assert H % 4 == 0 and W % 4 == 0, "stem expects H, W divisible by 4"
    Hc, Wc = H // 2, W // 2          # conv1 output size (stride 2, pad 3, k 7)
    Ho, Wo = Hc // 2, Wc // 2        # maxpool output size (stride 2, pad 1, k 3)

    # NCHW -> NHWC, spatial pad 3
    xp = jnp.pad(x.transpose(0, 2, 3, 1), ((0, 0), (3, 3), (3, 3), (0, 0)))

    # column-direction taps (kx = 0..6, stride 2 over w) packed on the last
    # axis: cols[n, h, wc, kx*Cin + ci] = xpad[n, h, 2*wc + kx, ci]
    cols = jnp.concatenate(
        [xp[:, :, kx:kx + 2 * Wc - 1:2, :] for kx in range(7)], axis=-1)

    # row phase split (stride-2 rows): phase p holds padded rows p, p+2, ...
    # Both phases have exactly Hc+3 rows for even H.
    xph = jnp.stack([cols[:, 0::2], cols[:, 1::2]], axis=1)  # (N,2,Hc+3,Wc,21)

    # Eval-mode BN folded: scale goes into the weights, shift stays in kernel.
    inv_std = 1.0 / jnp.sqrt(r_var + eps)
    scale = gamma * inv_std                                   # (Cout,)
    w_mat = w.transpose(2, 3, 1, 0).reshape(49 * Cin, Cout) * scale[None, :]
    shift = (beta - r_mean * scale).reshape(1, Cout)

    out_nhwc = _stem_pallas(xph, w_mat, shift, Hc, Wc, Ho, Wo, Cout)
    return out_nhwc.transpose(0, 3, 1, 2)                     # NCHW


if __name__ == "__main__":
    key = jax.random.PRNGKey(0)
    k1, k2, k3, k4, k5, k6 = jax.random.split(key, 6)

    N, Cin, H, W = 2, 3, 32, 32
    Cout, eps = 64, 1e-5

    x = jax.random.normal(k1, (N, Cin, H, W), jnp.float32)
    # Deterministic synthetic "pretrained" parameters.
    w = jax.random.normal(k2, (Cout, Cin, 7, 7), jnp.float32) * (2.0 / (Cin * 49)) ** 0.5
    gamma = jax.random.uniform(k3, (Cout,), jnp.float32, 0.5, 1.5)
    beta = jax.random.normal(k4, (Cout,), jnp.float32) * 0.1
    r_mean = jax.random.normal(k5, (Cout,), jnp.float32) * 0.1
    r_var = jax.random.uniform(k6, (Cout,), jnp.float32, 0.5, 1.5)

    fwd = jax.jit(visible_module_forward)
    out = jax.block_until_ready(fwd(x, w, gamma, beta, r_mean, r_var))

    # Plain-JAX reference for a sanity check.
    conv = lax.conv_general_dilated(
        x, w, window_strides=(2, 2), padding=((3, 3), (3, 3)),
        dimension_numbers=("NCHW", "OIHW", "NCHW"))
    bn = ((conv - r_mean[None, :, None, None])
          / jnp.sqrt(r_var + eps)[None, :, None, None]
          * gamma[None, :, None, None] + beta[None, :, None, None])
    relu = jnp.maximum(bn, 0.0)
    ref = lax.reduce_window(relu, -jnp.inf, lax.max,
                            (1, 1, 3, 3), (1, 1, 2, 2),
                            ((0, 0), (0, 0), (1, 1), (1, 1)))

    assert out.shape == (N, Cout, H // 4, W // 4), out.shape
    assert jnp.allclose(out, ref, atol=1e-2, rtol=1e-2)
    print("KERNEL_OK")
</pallas_src>

<mosaic_0001>
module attributes {stable_mosaic.version = 11 : i64} {
  func.func @_stem_kernel(%arg0: i32, %arg1: memref<1x2x19x16x21xf32, #tpu.memory_space<vmem>>, %arg2: memref<147x64xf32, #tpu.memory_space<vmem>>, %arg3: memref<1x64xf32, #tpu.memory_space<vmem>>, %arg4: memref<1x8x8x64xf32, #tpu.memory_space<vmem>>, %arg5: memref<16x16x64xf32, #tpu.memory_space<vmem>>, %arg6: memref<8x16x64xf32, #tpu.memory_space<vmem>>) attributes {dimension_semantics = [#tpu.dimension_semantics<parallel>], iteration_bounds = array<i64: 2>, scalar_prefetch = 0 : i64, scratch_operands = 2 : i64, tpu.core_type = #tpu.core_type<tc>, window_params = [{transform_indices = @transform_0, window_bounds = array<i64: 1, 2, 19, 16, 21>}, {pipeline_mode = #tpu.pipeline_mode<synchronous>, transform_indices = @transform_1, window_bounds = array<i64: 147, 64>}, {pipeline_mode = #tpu.pipeline_mode<synchronous>, transform_indices = @transform_2, window_bounds = array<i64: 1, 64>}, {transform_indices = @transform_3, window_bounds = array<i64: 1, 8, 8, 64>}]} {
    %c0 = arith.constant 0 : index
    %c0_0 = arith.constant 0 : index
    %c0_1 = arith.constant 0 : index
    %c0_2 = arith.constant 0 : index
    %c0_3 = arith.constant 0 : index
    %0 = vector.load %arg1[%c0, %c0_0, %c0_1, %c0_2, %c0_3] : memref<1x2x19x16x21xf32, #tpu.memory_space<vmem>>, vector<1x1x16x16x21xf32>
    %1 = vector.shape_cast %0 : vector<1x1x16x16x21xf32> to vector<16x16x21xf32>
    %c0_4 = arith.constant 0 : index
    %c1 = arith.constant 1 : index
    %c0_5 = arith.constant 0 : index
    %c0_6 = arith.constant 0 : index
    %c0_7 = arith.constant 0 : index
    %2 = vector.load %arg1[%c0_4, %c1, %c0_5, %c0_6, %c0_7] : memref<1x2x19x16x21xf32, #tpu.memory_space<vmem>>, vector<1x1x16x16x21xf32>
    %3 = vector.shape_cast %2 : vector<1x1x16x16x21xf32> to vector<16x16x21xf32>
    %c0_8 = arith.constant 0 : index
    %c0_9 = arith.constant 0 : index
    %c1_10 = arith.constant 1 : index
    %c0_11 = arith.constant 0 : index
    %c0_12 = arith.constant 0 : index
    %4 = vector.load %arg1[%c0_8, %c0_9, %c1_10, %c0_11, %c0_12] : memref<1x2x19x16x21xf32, #tpu.memory_space<vmem>>, vector<1x1x16x16x21xf32>
    %5 = vector.shape_cast %4 : vector<1x1x16x16x21xf32> to vector<16x16x21xf32>
    %c0_13 = arith.constant 0 : index
    %c1_14 = arith.constant 1 : index
    %c1_15 = arith.constant 1 : index
    %c0_16 = arith.constant 0 : index
    %c0_17 = arith.constant 0 : index
    %6 = vector.load %arg1[%c0_13, %c1_14, %c1_15, %c0_16, %c0_17] : memref<1x2x19x16x21xf32, #tpu.memory_space<vmem>>, vector<1x1x16x16x21xf32>
    %7 = vector.shape_cast %6 : vector<1x1x16x16x21xf32> to vector<16x16x21xf32>
    %c0_18 = arith.constant 0 : index
    %c0_19 = arith.constant 0 : index
    %c2 = arith.constant 2 : index
    %c0_20 = arith.constant 0 : index
    %c0_21 = arith.constant 0 : index
    %8 = vector.load %arg1[%c0_18, %c0_19, %c2, %c0_20, %c0_21] : memref<1x2x19x16x21xf32, #tpu.memory_space<vmem>>, vector<1x1x16x16x21xf32>
    %9 = vector.shape_cast %8 : vector<1x1x16x16x21xf32> to vector<16x16x21xf32>
    %c0_22 = arith.constant 0 : index
    %c1_23 = arith.constant 1 : index
    %c2_24 = arith.constant 2 : index
    %c0_25 = arith.constant 0 : index
    %c0_26 = arith.constant 0 : index
    %10 = vector.load %arg1[%c0_22, %c1_23, %c2_24, %c0_25, %c0_26] : memref<1x2x19x16x21xf32, #tpu.memory_space<vmem>>, vector<1x1x16x16x21xf32>
    %11 = vector.shape_cast %10 : vector<1x1x16x16x21xf32> to vector<16x16x21xf32>
    %c0_27 = arith.constant 0 : index
    %c0_28 = arith.constant 0 : index
    %c3 = arith.constant 3 : index
    %c0_29 = arith.constant 0 : index
    %c0_30 = arith.constant 0 : index
    %12 = vector.load %arg1[%c0_27, %c0_28, %c3, %c0_29, %c0_30] : memref<1x2x19x16x21xf32, #tpu.memory_space<vmem>>, vector<1x1x16x16x21xf32>
    %13 = vector.shape_cast %12 : vector<1x1x16x16x21xf32> to vector<16x16x21xf32>
    %14 = tpu.concatenate %1, %3, %5, %7, %9, %11, %13 in 2 : vector<16x16x21xf32>, vector<16x16x21xf32>, vector<16x16x21xf32>, vector<16x16x21xf32>, vector<16x16x21xf32>, vector<16x16x21xf32>, vector<16x16x21xf32> -> vector<16x16x147xf32>
    %15 = vector.shape_cast %14 : vector<16x16x147xf32> to vector<256x147xf32>
    %c0_31 = arith.constant 0 : index
    %c0_32 = arith.constant 0 : index
    %16 = vector.load %arg2[%c0_31, %c0_32] : memref<147x64xf32, #tpu.memory_space<vmem>>, vector<147x64xf32>
    %cst = arith.constant dense<0.000000e+00> : vector<256x64xf32>
    %17 = tpu.matmul %15, %16, %cst {dimension_numbers = #tpu.dot_dimension_numbers<[1], [0], [0], [1], [0, 0, 1, 1], [], []>} : vector<256x147xf32>, vector<147x64xf32>, vector<256x64xf32> -> vector<256x64xf32>
    %c0_33 = arith.constant 0 : index
    %c0_34 = arith.constant 0 : index
    %18 = vector.load %arg3[%c0_33, %c0_34] : memref<1x64xf32, #tpu.memory_space<vmem>>, vector<1x64xf32>
    %19 = vector.broadcast %18 : vector<1x64xf32> to vector<256x64xf32>
    %20 = arith.addf %17, %19 : vector<256x64xf32>
    %cst_35 = arith.constant 0.000000e+00 : f32
    %21 = vector.broadcast %cst_35 : f32 to vector<256x64xf32>
    %22 = arith.maximumf %20, %21 : vector<256x64xf32>
    %23 = vector.shape_cast %22 : vector<256x64xf32> to vector<16x16x64xf32>
    %c0_36 = arith.constant 0 : index
    %c0_37 = arith.constant 0 : index
    %c0_38 = arith.constant 0 : index
    %24 = vector.load %arg5[%c0_36, %c0_37, %c0_38] : memref<16x16x64xf32, #tpu.memory_space<vmem>>, vector<16x16x64xf32>
    tpu.vector_store %arg5[%c0_36, %c0_37, %c0_38], %23 {strides = array<i32>} : memref<16x16x64xf32, #tpu.memory_space<vmem>>, vector<16x16x64xf32>,
    %c0_39 = arith.constant 0 : index
    %c0_40 = arith.constant 0 : index
    %c0_41 = arith.constant 0 : index
    %25 = tpu.strided_load %arg5[%c0_39, %c0_40, %c0_41] {strides = array<i32: 2, 1, 1>} : memref<16x16x64xf32, #tpu.memory_space<vmem>>, vector<8x16x64xf32>
    %c1_42 = arith.constant 1 : index
    %c0_43 = arith.constant 0 : index
    %c0_44 = arith.constant 0 : index
    %26 = tpu.strided_load %arg5[%c1_42, %c0_43, %c0_44] {strides = array<i32: 2, 1, 1>} : memref<16x16x64xf32, #tpu.memory_space<vmem>>, vector<8x16x64xf32>
    %cst_45 = arith.constant 0.000000e+00 : f32
    %27 = vector.broadcast %cst_45 : f32 to vector<1x16x64xf32>
    %28 = vector.extract_strided_slice %26 {offsets = [0, 0, 0], sizes = [7, 16, 64], strides = [1, 1, 1]} : vector<8x16x64xf32> to vector<7x16x64xf32>
    %29 = tpu.concatenate %27, %28 in 0 : vector<1x16x64xf32>, vector<7x16x64xf32> -> vector<8x16x64xf32>
    %30 = arith.maximumf %25, %26 : vector<8x16x64xf32>
    %31 = arith.maximumf %30, %29 : vector<8x16x64xf32>
    %c0_46 = arith.constant 0 : index
    %c0_47 = arith.constant 0 : index
    %c0_48 = arith.constant 0 : index
    %32 = vector.load %arg6[%c0_46, %c0_47, %c0_48] : memref<8x16x64xf32, #tpu.memory_space<vmem>>, vector<8x16x64xf32>
    tpu.vector_store %arg6[%c0_46, %c0_47, %c0_48], %31 {strides = array<i32>} : memref<8x16x64xf32, #tpu.memory_space<vmem>>, vector<8x16x64xf32>,
    %c0_49 = arith.constant 0 : index
    %c0_50 = arith.constant 0 : index
    %c0_51 = arith.constant 0 : index
    %33 = tpu.strided_load %arg6[%c0_49, %c0_50, %c0_51] {strides = array<i32: 1, 2, 1>} : memref<8x16x64xf32, #tpu.memory_space<vmem>>, vector<8x8x64xf32>
    %c0_52 = arith.constant 0 : index
    %c1_53 = arith.constant 1 : index
    %c0_54 = arith.constant 0 : index
    %34 = tpu.strided_load %arg6[%c0_52, %c1_53, %c0_54] {strides = array<i32: 1, 2, 1>} : memref<8x16x64xf32, #tpu.memory_space<vmem>>, vector<8x8x64xf32>
    %cst_55 = arith.constant 0.000000e+00 : f32
    %35 = vector.broadcast %cst_55 : f32 to vector<8x1x64xf32>
    %36 = vector.extract_strided_slice %34 {offsets = [0, 0, 0], sizes = [8, 7, 64], strides = [1, 1, 1]} : vector<8x8x64xf32> to vector<8x7x64xf32>
    %37 = tpu.concatenate %35, %36 in 1 : vector<8x1x64xf32>, vector<8x7x64xf32> -> vector<8x8x64xf32>
    %38 = arith.maximumf %33, %34 : vector<8x8x64xf32>
    %39 = arith.maximumf %38, %37 : vector<8x8x64xf32>
    %c0_56 = arith.constant 0 : index
    %c0_57 = arith.constant 0 : index
    %c0_58 = arith.constant 0 : index
    %c0_59 = arith.constant 0 : index
    %40 = vector.load %arg4[%c0_56, %c0_57, %c0_58, %c0_59] : memref<1x8x8x64xf32, #tpu.memory_space<vmem>>, vector<1x8x8x64xf32>
    %41 = vector.shape_cast %40 : vector<1x8x8x64xf32> to vector<8x8x64xf32>
    %42 = vector.shape_cast %39 : vector<8x8x64xf32> to vector<1x8x8x64xf32>
    tpu.vector_store %arg4[%c0_56, %c0_57, %c0_58, %c0_59], %42 {strides = array<i32>} : memref<1x8x8x64xf32, #tpu.memory_space<vmem>>, vector<1x8x8x64xf32>,
    return
  }
  func.func @transform_0(%arg0: i32) -> (i32, i32, i32, i32, i32) {
    %c0_i32 = arith.constant 0 : i32
    %c0_i32_0 = arith.constant 0 : i32
    %c0_i32_1 = arith.constant 0 : i32
    %c0_i32_2 = arith.constant 0 : i32
    %c0_i32_3 = arith.constant 0 : i32
    return %arg0, %c0_i32, %c0_i32_0, %c0_i32_1, %c0_i32_2 : i32, i32, i32, i32, i32
  }
  func.func @transform_1(%arg0: i32) -> (i32, i32) {
    %c0_i32 = arith.constant 0 : i32
    %c0_i32_0 = arith.constant 0 : i32
    %c0_i32_1 = arith.constant 0 : i32
    return %c0_i32, %c0_i32_0 : i32, i32
  }
  func.func @transform_2(%arg0: i32) -> (i32, i32) {
    %c0_i32 = arith.constant 0 : i32
    %c0_i32_0 = arith.constant 0 : i32
    %c0_i32_1 = arith.constant 0 : i32
    return %c0_i32, %c0_i32_0 : i32, i32
  }
  func.func @transform_3(%arg0: i32) -> (i32, i32, i32, i32) {
    %c0_i32 = arith.constant 0 : i32
    %c0_i32_0 = arith.constant 0 : i32
    %c0_i32_1 = arith.constant 0 : i32
    %c0_i32_2 = arith.constant 0 : i32
    return %arg0, %c0_i32, %c0_i32_0, %c0_i32_1 : i32, i32, i32, i32
  }
}

</mosaic_0001>

<bundles_post_ra>
// kernel: visible_module_forward.1
= control target key start
LH: loop header
LB: loop body
LE: loop exit
PB: predicated region body
PF: predicated region fallthrough
CT: control target
= control target key end

     0   :  { %8 = vsyncpa [#allocation5], 0  ;;  %s3819_s0 = inlined_call_operand.vmem [shape: f32[2,2,19,16,21], index: 0, kind: input, shape index: {}]   ;;  %s3820_s1 = inlined_call_operand.vmem [shape: f32[147,64], index: 1, kind: input, shape index: {}]   ;;  %s3821_s2 = inlined_call_operand.vmem [shape: f32[1,64], index: 2, kind: input, shape index: {}]   ;;  %s3822_s3 = inlined_call_operand.hbm [shape: f32[2,8,8,64], index: 3, kind: output, shape index: {}]  }
   0x1   :  { %10 = vsyncpa [#allocation5 + $0x1], 0  ;;  %s2825_s12 = smov 0   ;;  %s2827_s13 = smov 0  }
   0x2   :  { %s2829_s14 = smov 0   ;;  %s2831_s15 = smov 0  }
   0x3 LB: > { %s2846_s16 = sadd.s32 4294967295, %s2792_s15   ;;  %s1995_s17 = sadd.s32 4294967294, %s2792_s15   ;;  %s2792_s15 = sphi %s2831_s15, %s3828_s15   ;;  %s2788_s14 = sphi %s2829_s14, %s3827_s14   ;;  %s2784_s13 = sphi %s2827_s13, %s3826_s13   ;;  %s2780_s12 = sphi %s2825_s12, %s3825_s12  }
   0x4   : > { %s2850_s18 = sadd.s32 1, %s2792_s15   ;;  %s91_s19 = sadd.s32 1, %s2788_s14 }
   0x5   : > { %s88_s20 = ssub.s32 %s2792_s15, %s2850_s18  ;;  %p101_p0 = scmp.ne.s32.totalorder %s2788_s14, %s2784_s13 }
   0x6   : > { %p89_p1 = scmp.eq.s32.totalorder %s88_s20, 0  ;;  %p102_p2 = scmp.eq.s32.totalorder %s2846_s16, 1 }
   0x7   : > { %p107_p3 = scmp.ne.s32.totalorder %s2784_s13, %s2780_s12  ;;  %p108_p4 = scmp.eq.s32.totalorder %s1995_s17, 1 }
   0x8   : > { %s2861_s21 = scalar_select %p89_p1, %s2788_s14, %s91_s19  }
   0x9   : > { %p2863_p5 = por %p102_p2, %p101_p0  ;;  %p2867_p6 = por %p108_p4, %p107_p3 }
   0xa   : > { %p1998_p7 = scmp.ge.s32.totalorder %s2792_s15, 1  ;;  %p140_p8 = scmp.lt.s32.totalorder %s2792_s15, 3 }
   0xc   : > { %p141_p9 = pnand %p1998_p7, %p140_p8 }
   0xd   : > { %p164_p10 = scmp.lt.s32.totalorder (!%p141_p9), %s2846_s16, 1  ;;  %v1365_v0 = vld [vmem:[%s3820_s1] sm:$0xff] (!%p141_p9)  ;;  %v1366_v1 = vld [vmem:[%s3820_s1 + $0x8] sm:$0xff] (!%p141_p9)  ;;  %v1367_v2 = vld [vmem:[%s3820_s1 + $0x10] sm:$0xff] (!%p141_p9)  ;;  %v2794_v3 = vmov (!%p141_p9), 0.0|0.0   ;;  %s2795_s27 = smov (!%p141_p9), 21  }
   0xe   : > { %144 = sbr.rel (%p141_p9) target bundleno = 623 (0x26f), region = 32  ;;  %2233 = vmatprep.subr.bf16.mxu0 (!%p141_p9), %v2794_v3  ;;  %v2234_v4 = vpack.c.bf16 (!%p141_p9), %v1366_v1, %v1365_v0  ;;  %2260 = vmatprep.subr.bf16.mxu1 (!%p141_p9), %v2794_v3  ;;  %v1368_v5 = vld [vmem:[%s3820_s1 + $0x18] sm:$0xff] (!%p141_p9)  ;;  %v1369_v7 = vld [vmem:[%s3820_s1 + $0x20] sm:$0xff] (!%p141_p9)  ;;  %v1370_v8 = vld [vmem:[%s3820_s1 + $0x28] sm:$0xff] (!%p141_p9)  ;;  %s2796_s9 = smov (!%p141_p9), 42   ;;  %vm1456_vm0 = vcmask (!%p141_p9), 1042432  }
   0xf   : > { %v2237_v6 = vpack.c.bf16 (!%p141_p9), %v1368_v5, %v1367_v2  ;;  %v1371_v9 = vld [vmem:[%s3820_s1 + $0x30] sm:$0xff] (!%p141_p9)  ;;  %v1372_v10 = vld [vmem:[%s3820_s1 + $0x38] sm:$0xff] (!%p141_p9)  ;;  %v2240_v14 = vpack.c.bf16 (!%p141_p9), %v1370_v8, %v1369_v7  ;;  %v1373_v27 = vld [vmem:[%s3820_s1 + $0x40] sm:$0xff] (!%p141_p9)  ;;  %s2797_s24 = smov (!%p141_p9), 84   ;;  %s2798_s25 = smov (!%p141_p9), 63   ;;  %vm1167_vm1 = vcmask (!%p141_p9), 171008  }
  0x10   : > { %2235 = vmatpush1.bf16.msra.mxu0 (!%p141_p9), %v2234_v4  ;;  %2270 = vmatpush1.bf16.msra.mxu1 (!%p141_p9), %v2234_v4  ;;  %v2243_v26 = vpack.c.bf16 (!%p141_p9), %v1372_v10, %v1371_v9  ;;  %v1374_v30 = vld [vmem:[%s3820_s1 + $0x48] sm:$0xff] (!%p141_p9)  ;;  %v1375_v37 = vld [vmem:[%s3820_s1 + $0x50] sm:$0xff] (!%p141_p9)  ;;  %v1376_v38 = vld [vmem:[%s3820_s1 + $0x58] sm:$0xff] (!%p141_p9)  ;;  %s2799_s4 = smov (!%p141_p9), 105   ;;  %s2800_s10 = smov (!%p141_p9), 126   ;;  %v2801_v4 = vmov (!%p141_p9), 0.0  }
  0x11   : > { %2236 = vmatprep.subr.bf16.mxu0 (!%p141_p9), %v2794_v3  ;;  %2261 = vmatprep.subr.bf16.mxu1 (!%p141_p9), %v2794_v3  ;;  %v2246_v35 = vpack.c.bf16 (!%p141_p9), %v1374_v30, %v1373_v27  ;;  %v2249_v42 = vpack.c.bf16 (!%p141_p9), %v1376_v38, %v1375_v37  ;;  %v1377_v44 = vld [vmem:[%s3820_s1 + $0x60] sm:$0xff] (!%p141_p9)  ;;  %v1378_v45 = vld [vmem:[%s3820_s1 + $0x68] sm:$0xff] (!%p141_p9)  ;;  %v1379_v51 = vld [vmem:[%s3820_s1 + $0x70] sm:$0xff] (!%p141_p9)  ;;  %vm1200_vm2 = vcmask (!%p141_p9), 343040   ;;  %vm1233_vm3 = vcmask (!%p141_p9), 515072  }
  0x12   : > { %v2252_v48 = vpack.c.bf16 (!%p141_p9), %v1378_v45, %v1377_v44  ;;  %v1380_v52 = vld [vmem:[%s3820_s1 + $0x78] sm:$0xff] (!%p141_p9)  ;;  %v1381_v57 = vld [vmem:[%s3820_s1 + $0x80] sm:$0xff] (!%p141_p9)  ;;  %v1382_v58 = vld [vmem:[%s3820_s1 + $0x88] sm:$0xff] (!%p141_p9)  ;;  %vm1266_vm4 = vcmask (!%p141_p9), 687104   ;;  %vm1299_vm5 = vcmask (!%p141_p9), 859136   ;;  %vm1391_vm6 = vcmask (!%p141_p9), 154624  }
  0x13   : > { %v2255_v56 = vpack.c.bf16 (!%p141_p9), %v1380_v52, %v1379_v51  ;;  %v2258_v61 = vpack.c.bf16 (!%p141_p9), %v1382_v58, %v1381_v57  ;;  %v1383_v5 = vld [vmem:[%s3820_s1 + $0x90] sm:$0x7] (!%p141_p9)  ;;  %vm1332_vm7 = vcmask (!%p141_p9), 1031168   ;;  %vm1717_vm8 = vcmask (!%p141_p9), 523264  }
  0x14   : > { %2238 = vmatpush1.bf16.msra.mxu0 (!%p141_p9), %v2237_v6  ;;  %2271 = vmatpush1.bf16.msra.mxu1 (!%p141_p9), %v2237_v6  ;;  %vm1886_vm9 = vcmask (!%p141_p9), 1040384  }
  0x15   : > { %s165_s5 = scalar_select %p164_p10, %s2846_s16, 1  ;;  %2239 = vmatprep.subr.bf16.mxu0 %v2794_v3  ;;  %2262 = vmatprep.subr.bf16.mxu1 %v2794_v3 }
  0x17   : > { %s2280_s6 = smul.u32 608, %s165_s5  ;;  %s2802_s5 = smov [#allocation4]  }
  0x18   : > { %2241 = vmatpush1.bf16.msra.mxu0 %v2240_v14  ;;  %2272 = vmatpush1.bf16.msra.mxu1 %v2240_v14 }
  0x19   : > { %s2900_s19 = scalar_lea.vmem %s3819_s0, %s2280_s6  ;;  %2242 = vmatprep.subr.bf16.mxu0 %v2794_v3  ;;  %2263 = vmatprep.subr.bf16.mxu1 %v2794_v3  ;;  %s2734_s6 = sshll.u32 %s2802_s5, 4  ;;  %s2735_s6 = int_to_ptr.vmem [resolvable:$false] %s2734_s6 }
  0x1a   : > { %v2005_v11 = vld [vmem:[%s2900_s19 + $0x150] sm:$0xff]  ;;  %v2910_v12 = vld [vmem:[%s2900_s19 + $0x158] sm:$0xff]  ;;  %v2916_v17 = vld [vmem:[%s2900_s19 + $0x160] sm:$0xff]  ;;  %s2736_s7 = scalar_lea.vmem %s2735_s6, 2048 }
  0x1b   : > { %v2001_v13 = vld [vmem:[%s2900_s19 + $0x130] sm:$0xff]  ;;  %v2340_v15 = vpack.i.bf16 %v2910_v12, %v2005_v11  ;;  %v2002_v16 = vld [vmem:[%s2900_s19 + $0x138] sm:$0xff]  ;;  %v2919_v18 = vld [vmem:[%s2900_s19 + $0x168] sm:$0xff] }
  0x1c   : > { %v2330_v19 = vpack.i.bf16 %v2002_v16, %v2001_v13  ;;  %v2003_v20 = vld [vmem:[%s2900_s19 + $0x140] sm:$0xff]  ;;  %v2925_v21 = vld [vmem:[%s2900_s19 + $0x148] sm:$0xff]  ;;  %v2345_v22 = vpack.i.bf16 %v2919_v18, %v2916_v17  ;;  %v2933_v24 = vld [vmem:[%s2900_s19 + $0x10] sm:$0xff]  ;;  %2244 = vmatpush1.bf16.msra.mxu0 %v2243_v26  ;;  %2273 = vmatpush1.bf16.msra.mxu1 %v2243_v26 }
  0x1d   : > { %2341 = vrot.lane.b32.xlu1 %v2340_v15, %s2795_s27  ;;  %v2335_v23 = vpack.i.bf16 %v2925_v21, %v2003_v20  ;;  %v2936_v25 = vld [vmem:[%s2900_s19 + $0x90] sm:$0xff]  ;;  %v2956_v33 = vld [vmem:[%s2900_s19 + $0x20] sm:$0xff]  ;;  %2245 = vmatprep.subr.bf16.mxu0 %v2794_v3  ;;  %v2018_v43 = vld [vmem:[%s2900_s19 + $0x1b8] sm:$0xff] }
  0x1e   : > { %2331 = vrot.lane.b32.xlu0 %v2330_v19, %s2795_s27  ;;  %v2942_v28 = vld [vmem:[%s2900_s19 + $0x170] sm:$0xff]  ;;  %v2355_v31 = vpack.i.bf16 %v2936_v25, %v2933_v24  ;;  %v2959_v34 = vld [vmem:[%s2900_s19 + $0xa0] sm:$0xff]  ;;  %2264 = vmatprep.subr.bf16.mxu1 %v2794_v3  ;;  %v2993_v49 = vld [vmem:[%s2900_s19 + $0x18] sm:$0xff] }
  0x1f   : > { %v2017_v29 = vld [vmem:[%s2900_s19 + $0x1b0] sm:$0xff]  ;;  %v2081_v36 = vld [vmem:[%s2900_s19 + $0x1c0] sm:$0xff]  ;;  %v2973_v39 = vpack.i.bf16 %v2959_v34, %v2956_v33  ;;  %v2996_v50 = vld [vmem:[%s2900_s19 + $0x98] sm:$0xff] }
  0x20   : > { %v2350_v32 = vpack.i.bf16 %v2017_v29, %v2942_v28  ;;  %v2360_v40 = vpack.i.bf16 %v2081_v36, %v2003_v20  ;;  %v2977_v41 = vld [vmem:[%s2900_s19 + $0x1d0] sm:$0xff]  ;;  %2247 = vmatpush1.bf16.msra.mxu0 %v2246_v35  ;;  %2274 = vmatpush1.bf16.msra.mxu1 %v2246_v35  ;;  %v2370_v47 = vpack.i.bf16 %v2081_v36, %v2018_v43  ;;  %v2082_v55 = vld [vmem:[%s2900_s19 + $0x1c8] sm:$0xff]  ;;  %v2146_v60 = vld [vmem:[%s2900_s19 + $0x1d8] sm:$0xff] }
  0x21   : > { %2346 = vrot.lane.b32.xlu1 %v2345_v22, %s2795_s27  ;;  %2248 = vmatprep.subr.bf16.mxu0 %v2794_v3  ;;  %v2375_v46 = vpack.i.bf16 %v2977_v41, %v2005_v11  ;;  %v3009_v53 = vld [vmem:[%s2900_s19 + $0x30] sm:$0xff]  ;;  %v2380_v54 = vpack.i.bf16 %v2996_v50, %v2993_v49  ;;  %v2385_v59 = vpack.i.bf16 %v2082_v55, %v2925_v21  ;;  %v3029_v63 = vld [vmem:[%s2900_s19 + $0x28] sm:$0xff]  ;;  %v2178_v6 = vld [vmem:[%s2900_s19 + $0xb8] sm:$0xff] }
  0x22   : > { %2336 = vrot.lane.b32.xlu0 %v2335_v23, %s2795_s27  ;;  %2265 = vmatprep.subr.bf16.mxu1 %v2794_v3  ;;  %v2177_v62 = vld [vmem:[%s2900_s19 + $0xb0] sm:$0xff]  ;;  %v2114_v0 = vld [vmem:[%s2900_s19 + $0xa8] sm:$0xff]  ;;  %v2395_v1 = vpack.i.bf16 %v2146_v60, %v2910_v12  ;;  %v2415_v7 = vpack.i.bf16 %v2977_v41, %v2082_v55  ;;  %v2147_v9 = vld [vmem:[%s2900_s19 + $0x1e0] sm:$0xff] }
  0x23   : > { %v2390_v2 = vpack.i.bf16 %v2114_v0, %v3029_v63  ;;  %v2410_v8 = vpack.i.bf16 %v2177_v62, %v3009_v53  ;;  %v2420_v10 = vpack.i.bf16 %v2147_v9, %v2916_v17  ;;  %v2179_v11 = vld [vmem:[%s2900_s19 + $0xc0] sm:$0xff]  ;;  %v2148_v14 = vld [vmem:[%s2900_s19 + $0x1e8] sm:$0xff]  ;;  %v2149_v20 = vld [vmem:[%s2900_s19 + $0x1f0] sm:$0xff]  ;;  %v2460_v21 = vpack.i.bf16 %v2147_v9, %v2146_v60 }
  0x24   : > { %2250 = vmatpush1.bf16.msra.mxu0 %v2249_v42  ;;  %2275 = vmatpush1.bf16.msra.mxu1 %v2249_v42  ;;  %v3063_v12 = vld [vmem:[%s2900_s19 + $0x40] sm:$0xff]  ;;  %v2440_v15 = vpack.i.bf16 %v2148_v14, %v2919_v18  ;;  %v2180_v16 = vld [vmem:[%s2900_s19 + $0xc8] sm:$0xff]  ;;  %v2465_v18 = vpack.i.bf16 %v2149_v20, %v2942_v28  ;;  %v2165_v22 = vld [vmem:[%s2900_s19 + $0x50] sm:$0xff] }
  0x25   : > { %2356 = vrot.lane.b32.xlu1 %v2355_v31, %s2796_s9  ;;  %2251 = vmatprep.subr.bf16.mxu0 %v2794_v3  ;;  %v2164_v17 = vld [vmem:[%s2900_s19 + $0x48] sm:$0xff]  ;;  %v2455_v19 = vpack.i.bf16 %v2179_v11, %v3063_v12  ;;  %v2134_v23 = vld [vmem:[%s2900_s19 + $0x178] sm:$0xff]  ;;  %v2181_v27 = vld [vmem:[%s2900_s19 + $0xd0] sm:$0xff] }
  0x26   : > { %2351 = vrot.lane.b32.xlu0 %v2350_v32, %s2795_s27  ;;  %2266 = vmatprep.subr.bf16.mxu1 %v2794_v3  ;;  %v2150_v26 = vld [vmem:[%s2900_s19 + $0x1f8] sm:$0xff]  ;;  %v2480_v29 = vpack.i.bf16 %v2180_v16, %v2164_v17  ;;  %v2505_v32 = vpack.i.bf16 %v2149_v20, %v2148_v14  ;;  %v2500_v35 = vpack.i.bf16 %v2181_v27, %v2165_v22  ;;  %v2135_v36 = vld [vmem:[%s2900_s19 + $0x180] sm:$0xff]  ;;  %v2136_v42 = vld [vmem:[%s2900_s19 + $0x188] sm:$0xff] }
  0x27   : > { %v2485_v28 = vpack.i.bf16 %v2150_v26, %v2134_v23  ;;  %v2166_v30 = vld [vmem:[%s2900_s19 + $0x58] sm:$0xff]  ;;  %v2151_v37 = vld [vmem:[%s2900_s19 + $0x200] sm:$0xff]  ;;  %v2152_v43 = vld [vmem:[%s2900_s19 + $0x208] sm:$0xff] }
  0x28   : > { %2253 = vmatpush1.bf16.msra.mxu0 %v2252_v48  ;;  %2276 = vmatpush1.bf16.msra.mxu1 %v2252_v48  ;;  %v2182_v31 = vld [vmem:[%s2900_s19 + $0xd8] sm:$0xff]  ;;  %v3106_v38 = vpack.i.bf16 %v2151_v37, %v2135_v36  ;;  %v3119_v44 = vpack.i.bf16 %v2152_v43, %v2136_v42  ;;  %v2184_v45 = vld [vmem:[%s2900_s19 + $0xe8] sm:$0xff]  ;;  %v2137_v48 = vld [vmem:[%s2900_s19 + $0x190] sm:$0xff] }
  0x29   : > { %2366 = vrot.lane.b32.xlu1 %v2973_v39, %s2797_s24  ;;  %2254 = vmatprep.subr.bf16.mxu0 %v2794_v3  ;;  %v2525_v41 = vpack.i.bf16 %v2182_v31, %v2166_v30  ;;  %v2153_v51 = vld [vmem:[%s2900_s19 + $0x210] sm:$0xff]  ;;  %v3195_v36 = vld [vmem:[%s2900_s19 + $0xf8] sm:$0xff]  ;;  %v170_v43 = vld [vmem:[%s2900_s19 + $0x8] sm:$0xff] }
  0x2a   : > { %2361 = vrot.lane.b32.xlu0 %v2360_v40, %s2798_s25  ;;  %2267 = vmatprep.subr.bf16.mxu1 %v2794_v3  ;;  %v2167_v40 = vld [vmem:[%s2900_s19 + $0x60] sm:$0xff]  ;;  %v3138_v55 = vpack.i.bf16 %v2153_v51, %v2137_v48  ;;  %v3150_v58 = vld [vmem:[%s2900_s19 + $0x70] sm:$0xff] }
  0x2c   : > { %2256 = vmatpush1.bf16.msra.mxu0 %v2255_v56  ;;  %2277 = vmatpush1.bf16.msra.mxu1 %v2255_v56 }
  0x2d   : > { %2376 = vrot.lane.b32.xlu1 %v2375_v46, %s2799_s4  ;;  %2257 = vmatprep.subr.bf16.mxu0 %v2794_v3 }
  0x2e   : > { %2371 = vrot.lane.b32.xlu0 %v2370_v47, %s2795_s27  ;;  %2268 = vmatprep.subr.bf16.mxu1 %v2794_v3  ;;  %v3044_v3 = vld [vmem:[%s2900_s19 + $0x38] sm:$0xff] }
  0x2f   : > { %v2435_v13 = vpack.i.bf16 %v2178_v6, %v3044_v3 }
  0x30   : > { %2259 = vmatpush1.bf16.msra.mxu0 %v2258_v61  ;;  %2278 = vmatpush1.bf16.msra.mxu1 %v2258_v61 }
  0x31   : > { %1071 = vrot.lane.b32.xlu1 %v3009_v53, %s2800_s10  ;;  %1496 = vmatprep.subr.mxu0 %v2801_v4 }
  0x32   : > { %2381 = vrot.lane.b32.xlu0 %v2380_v54, %s2796_s9  ;;  %2269 = vmatprep.subr.mxu1 %v2801_v4 }
  0x34   : > { %2194 = vmatpush1.msk.msra.mxu0 %vm1456_vm0, %v1383_v5  ;;  %2279 = vmatpush1.msk.msra.mxu1 %vm1456_vm0, %v1383_v5 }
  0x35   : > { %2386 = vrot.lane.b32.xlu1 %v2385_v59, %s2798_s25 }
  0x36   : > { %1103 = vrot.lane.b32.xlu0 %v2177_v62, %s2800_s10  ;;  %v169_v62 = vld [vmem:[%s2900_s19] sm:$0xff] }
  0x39   : > { %2396 = vrot.lane.b32.xlu1 %v2395_v1, %s2799_s4 }
  0x3a   : > { %2391 = vrot.lane.b32.xlu0 %v2390_v2, %s2797_s24 }
  0x3d   : > { %1073 = vrot.lane.b32.xlu1 %v3044_v3, %s2800_s10 }
  0x3e   : > { %2401 = vrot.lane.b32.xlu0 %v2973_v39, %s2796_s9  ;;  %v2183_v39 = vld [vmem:[%s2900_s19 + $0xe0] sm:$0xff] }
  0x3f   : > { %v3127_v47 = vpack.i.bf16 %v2183_v39, %v2167_v40 }
  0x41   : > { %2406 = vrot.lane.b32.xlu1 %v2375_v46, %s2798_s25  ;;  %v2168_v46 = vld [vmem:[%s2900_s19 + $0x68] sm:$0xff] }
  0x42   : > { %1105 = vrot.lane.b32.xlu0 %v2178_v6, %s2800_s10 }
  0x45   : > { %2416 = vrot.lane.b32.xlu1 %v2415_v7, %s2795_s27  ;;  %v3163_v7 = vld [vmem:[%s2900_s19 + $0x80] sm:$0xff] }
  0x46   : > { %2411 = vrot.lane.b32.xlu0 %v2410_v8, %s2797_s24 }
  0x49   : > { %2426 = vrot.lane.b32.xlu1 %v2390_v2, %s2796_s9  ;;  %v2185_v2 = vld [vmem:[%s2900_s19 + $0xf0] sm:$0xff] }
  0x4a   : > { %2421 = vrot.lane.b32.xlu0 %v2420_v10, %s2799_s4 }
  0x4d   : > { %1107 = vrot.lane.b32.xlu1 %v2179_v11, %s2800_s10  ;;  %v3169_v11 = vpack.i.bf16 %v2184_v45, %v2168_v46 }
  0x4e   : > { %1075 = vrot.lane.b32.xlu0 %v3063_v12, %s2800_s10 }
  0x51   : > { %2436 = vrot.lane.b32.xlu1 %v2435_v13, %s2797_s24 }
  0x52   : > { %2431 = vrot.lane.b32.xlu0 %v2395_v1, %s2798_s25 }
  0x55   : > { %2446 = vrot.lane.b32.xlu1 %v2410_v8, %s2796_s9 }
  0x56   : > { %2441 = vrot.lane.b32.xlu0 %v2440_v15, %s2799_s4 }
  0x59   : > { %1109 = vrot.lane.b32.xlu1 %v2180_v16, %s2800_s10  ;;  %v2138_v16 = vld [vmem:[%s2900_s19 + $0x198] sm:$0xff] }
  0x5a   : > { %1077 = vrot.lane.b32.xlu0 %v2164_v17, %s2800_s10  ;;  %v2154_v17 = vld [vmem:[%s2900_s19 + $0x218] sm:$0xff] }
  0x5b   : > { %v3183_v23 = vpack.i.bf16 %v2154_v17, %v2138_v16 }
  0x5d   : > { %2456 = vrot.lane.b32.xlu1 %v2455_v19, %s2797_s24 }
  0x5e   : > { %2451 = vrot.lane.b32.xlu0 %v2420_v10, %s2798_s25 }
  0x61   : > { %2466 = vrot.lane.b32.xlu1 %v2465_v18, %s2799_s4 }
  0x62   : > { %2461 = vrot.lane.b32.xlu0 %v2460_v21, %s2795_s27 }
  0x65   : > { %1079 = vrot.lane.b32.xlu1 %v2165_v22, %s2800_s10 }
  0x66   : > { %2471 = vrot.lane.b32.xlu0 %v2435_v13, %s2796_s9 }
  0x69   : > { %2476 = vrot.lane.b32.xlu1 %v2440_v15, %s2798_s25 }
  0x6a   : > { %1111 = vrot.lane.b32.xlu0 %v2181_v27, %s2800_s10 }
  0x6d   : > { %2486 = vrot.lane.b32.xlu1 %v2485_v28, %s2799_s4 }
  0x6e   : > { %2481 = vrot.lane.b32.xlu0 %v2480_v29, %s2797_s24 }
  0x71   : > { %1081 = vrot.lane.b32.xlu1 %v2166_v30, %s2800_s10 }
  0x72   : > { %2491 = vrot.lane.b32.xlu0 %v2455_v19, %s2796_s9 }
  0x75   : > { %2496 = vrot.lane.b32.xlu1 %v2465_v18, %s2798_s25 }
  0x76   : > { %1113 = vrot.lane.b32.xlu0 %v2182_v31, %s2800_s10 }
  0x79   : > { %2506 = vrot.lane.b32.xlu1 %v2505_v32, %s2795_s27 }
  0x7a   : > { %2501 = vrot.lane.b32.xlu0 %v2500_v35, %s2797_s24 }
  0x7d   : > { %2516 = vrot.lane.b32.xlu1 %v2480_v29, %s2796_s9 }
  0x7e   : > { %2511 = vrot.lane.b32.xlu0 %v3106_v38, %s2799_s4 }
  0x81   : > { %1115 = vrot.lane.b32.xlu1 %v2183_v39, %s2800_s10 }
  0x82   : > { %1083 = vrot.lane.b32.xlu0 %v2167_v40, %s2800_s10 }
  0x85   : > { %2526 = vrot.lane.b32.xlu1 %v2525_v41, %s2797_s24 }
  0x86   : > { %2521 = vrot.lane.b32.xlu0 %v2485_v28, %s2798_s25 }
  0x89   : > { %2536 = vrot.lane.b32.xlu1 %v2500_v35, %s2796_s9 }
  0x8a   : > { %2531 = vrot.lane.b32.xlu0 %v3119_v44, %s2799_s4 }
  0x8d   : > { %1117 = vrot.lane.b32.xlu1 %v2184_v45, %s2800_s10 }
  0x8e   : > { %1085 = vrot.lane.b32.xlu0 %v2168_v46, %s2800_s10 }
  0x8f   : > { %v3132_v52 = vpop.permute.xlu1 %2341 }
  0x90   : > { %v3134_v54 = vpop.permute.xlu0 %2331 }
  0x91   : > { %2546 = vrot.lane.b32.xlu1 %v3127_v47, %s2797_s24  ;;  %v2333_v61 = vunpack.i.l.bf16 %v3134_v54  ;;  %v2334_v40 = vunpack.i.h.bf16 %v3134_v54  ;;  %v2139_v54 = vld [vmem:[%s2900_s19 + $0x1a0] sm:$0xff] }
  0x92   : > { %2541 = vrot.lane.b32.xlu0 %v3106_v38, %s2798_s25 }
  0x93   : > { %v3142_v56 = vpop.permute.xlu1 %2346  ;;  %v1168_v6 = vsel %vm1167_vm1, %v169_v62, %v2333_v61  ;;  %v3217_v61 = vld [vmem:[%s2900_s19 + $0x88] sm:$0xff] }
  0x94   : > { %v3144_v57 = vpop.permute.xlu0 %2336 }
  0x95   : > { %2556 = vrot.lane.b32.xlu1 %v3138_v55, %s2799_s4 }
  0x96   : > { %2551 = vrot.lane.b32.xlu0 %v2485_v28, %s2795_s27 }
  0x97   : > { %v2357_v59 = vpop.permute.xlu1 %2356 }
  0x98   : > { %v3152_v60 = vpop.permute.xlu0 %2351  ;;  %v2358_v0 = vunpack.i.l.bf16 %v2357_v59  ;;  %v2359_v13 = vunpack.i.h.bf16 %v2357_v59  ;;  %v2155_v59 = vld [vmem:[%s2900_s19 + $0x220] sm:$0xff] }
  0x99   : > { %1087 = vrot.lane.b32.xlu1 %v3150_v58, %s2800_s10  ;;  %v2354_v4 = vunpack.i.h.bf16 %v3152_v60 }
  0x9a   : > { %2561 = vrot.lane.b32.xlu0 %v2525_v41, %s2796_s9  ;;  %v1201_v10 = vsel %vm1200_vm2, %v1168_v6, %v2358_v0 }
  0x9b   : > { %v2367_v1 = vpop.permute.xlu1 %2366  ;;  %v1184_v19 = vsel %vm1167_vm1, %v3163_v7, %v2354_v4 }
  0x9c   : > { %v2362_v5 = vpop.permute.xlu0 %2361  ;;  %v2368_v8 = vunpack.i.l.bf16 %v2367_v1  ;;  %v2369_v27 = vunpack.i.h.bf16 %v2367_v1  ;;  %v1217_v28 = vsel %vm1200_vm2, %v1184_v19, %v2359_v13  ;;  %v1169_v1 = vsel %vm1167_vm1, %v170_v43, %v2334_v40 }
  0x9d   : > { %v2363_v9 = vunpack.i.l.bf16 %v2362_v5  ;;  %2566 = vrot.lane.b32.xlu1 %v3119_v44, %s2798_s25  ;;  %v2364_v20 = vunpack.i.h.bf16 %v2362_v5 }
  0x9e   : > { %1119 = vrot.lane.b32.xlu0 %v2185_v2, %s2800_s10 }
  0x9f   : > { %v1234_v14 = vsel %vm1233_vm3, %v1201_v10, %v2363_v9  ;;  %v2377_v15 = vpop.permute.xlu1 %2376  ;;  %v1250_v30 = vsel %vm1233_vm3, %v1217_v28, %v2364_v20  ;;  %v3223_v9 = vpack.i.bf16 %v2155_v59, %v2139_v54  ;;  %v2156_v54 = vld [vmem:[%s2900_s19 + $0x228] sm:$0xff] }
  0xa0   : > { %v2378_v18 = vunpack.i.l.bf16 %v2377_v15  ;;  %v3176_v21 = vpop.permute.xlu0 %2371  ;;  %v1267_v22 = vsel %vm1266_vm4, %v1234_v14, %v2368_v8  ;;  %v2379_v31 = vunpack.i.h.bf16 %v2377_v15  ;;  %v1283_v39 = vsel %vm1266_vm4, %v1250_v30, %v2369_v27 }
  0xa1   : > { %2576 = vrot.lane.b32.xlu1 %v3106_v38, %s2795_s27  ;;  %v3198_v38 = vld [vmem:[%s2900_s19 + $0x78] sm:$0xff]  ;;  %v2373_v48 = vunpack.i.l.bf16 %v3176_v21 }
  0xa2   : > { %2571 = vrot.lane.b32.xlu0 %v3169_v11, %s2797_s24  ;;  %v1300_v26 = vsel %vm1299_vm5, %v1267_v22, %v2378_v18  ;;  %v1316_v42 = vsel %vm1299_vm5, %v1283_v39, %v2379_v31  ;;  %v2338_v31 = vunpack.i.l.bf16 %v3144_v57 }
  0xa3   : > { %v1072_v29 = vpop.permute.xlu1 %1071  ;;  %v1185_v10 = vsel %vm1167_vm1, %v3217_v61, %v2373_v48 }
  0xa4   : > { %v2382_v32 = vpop.permute.xlu0 %2381  ;;  %2195 = vmatprep.mubr.msk.f32.mxu0 %vm1391_vm6, %v1072_v29  ;;  %v1333_v35 = vsel %vm1332_vm7, %v1300_v26, %v1072_v29 }
  0xa5   : > { %2586 = vrot.lane.b32.xlu1 %v3127_v47, %s2796_s9  ;;  %1525 = vmatmul.mubr.f32.vlgmr.msra.gmra.mrb[0].mxu0 %v1333_v35  ;;  %v2383_v45 = vunpack.i.l.bf16 %v2382_v32  ;;  %v3209_v47 = vpack.i.bf16 %v2185_v2, %v3150_v58  ;;  %v2384_v62 = vunpack.i.h.bf16 %v2382_v32  ;;  %v2187_v35 = vld [vmem:[%s2900_s19 + $0x100] sm:$0xff] }
  0xa6   : > { %2581 = vrot.lane.b32.xlu0 %v3183_v23, %s2799_s4 }
  0xa7   : > { %v2387_v37 = vpop.permute.xlu1 %2386  ;;  %v1202_v58 = vsel %vm1200_vm2, %v1169_v1, %v2383_v45  ;;  %v1218_v14 = vsel %vm1200_vm2, %v1185_v10, %v2384_v62  ;;  %v1170_v45 = vsel %vm1167_vm1, %v2933_v24, %v2338_v31  ;;  %v2339_v10 = vunpack.i.h.bf16 %v3144_v57  ;;  %v2157_v31 = vld [vmem:[%s2900_s19 + $0x230] sm:$0xff] }
  0xa8   : > { %v1104_v41 = vpop.permute.xlu0 %1103  ;;  %v2388_v51 = vunpack.i.l.bf16 %v2387_v37  ;;  %v2389_v4 = vunpack.i.h.bf16 %v2387_v37 }
  0xa9   : > { %2211 = vmatprep.mubr.msk.f32.mxu1 %vm1391_vm6, %v1104_v41  ;;  %1121 = vrot.lane.b32.xlu1 %v3195_v36, %s2800_s10  ;;  %v1349_v46 = vsel %vm1332_vm7, %v1316_v42, %v1104_v41 }
  0xaa   : > { %1089 = vrot.lane.b32.xlu0 %v3198_v38, %s2800_s10  ;;  %1605 = vmatmul.mubr.f32.vlgmr.msra.gmra.mrb[0].mxu1 %v1349_v46  ;;  %v1235_v13 = vsel %vm1233_vm3, %v1202_v58, %v2388_v51  ;;  %v1251_v17 = vsel %vm1233_vm3, %v1218_v14, %v2389_v4  ;;  %v2140_v51 = vld [vmem:[%s2900_s19 + $0x1a8] sm:$0xff] }
  0xab   : > { %v2397_v0 = vpop.permute.xlu1 %2396  ;;  %v3274_v24 = vpack.i.bf16 %v2156_v54, %v2140_v51  ;;  %v2343_v51 = vunpack.i.l.bf16 %v3132_v52 }
  0xac   : > { %v2398_v5 = vunpack.i.l.bf16 %v2397_v0  ;;  %v2392_v6 = vpop.permute.xlu0 %2391  ;;  %v2399_v19 = vunpack.i.h.bf16 %v2397_v0 }
  0xad   : > { %v2394_v2 = vunpack.i.h.bf16 %v2392_v6  ;;  %v2393_v8 = vunpack.i.l.bf16 %v2392_v6  ;;  %2596 = vrot.lane.b32.xlu1 %v3209_v47, %s2797_s24 }
  0xae   : > { %2591 = vrot.lane.b32.xlu0 %v3138_v55, %s2798_s25 }
  0xaf   : > { %v1074_v15 = vpop.permute.xlu1 %1073  ;;  %v1268_v16 = vsel %vm1266_vm4, %v1235_v13, %v2393_v8  ;;  %v1284_v26 = vsel %vm1266_vm4, %v1251_v17, %v2394_v2  ;;  %v3291_v17 = vld [vmem:[%s2900_s19 + $0x108] sm:$0xff] }
  0xb0   : > { %v2402_v20 = vpop.permute.xlu0 %2401  ;;  %2196 = vmatprep.mubr.msk.f32.mxu0 %vm1391_vm6, %v1074_v15  ;;  %v1301_v18 = vsel %vm1299_vm5, %v1268_v16, %v2398_v5  ;;  %v1317_v29 = vsel %vm1299_vm5, %v1284_v26, %v2399_v19 }
  0xb1   : > { %2606 = vrot.lane.b32.xlu1 %v3223_v9, %s2799_s4  ;;  %v1334_v22 = vsel %vm1332_vm7, %v1301_v18, %v1074_v15  ;;  %v2404_v37 = vunpack.i.h.bf16 %v2402_v20  ;;  %v2403_v39 = vunpack.i.l.bf16 %v2402_v20  ;;  %v3294_v20 = vpack.i.bf16 %v2187_v35, %v3163_v7 }
  0xb2   : > { %2601 = vrot.lane.b32.xlu0 %v3119_v44, %s2795_s27  ;;  %1530 = vmatmul.mubr.f32.gmra.mrb[2].mxu0 %v1334_v22  ;;  %v2374_v44 = vunpack.i.h.bf16 %v3176_v21  ;;  %v3258_v21 = vpack.i.bf16 %v3195_v36, %v3198_v38 }
  0xb3   : > { %v2407_v27 = vpop.permute.xlu1 %2406  ;;  %v1203_v59 = vsel %vm1200_vm2, %v1170_v45, %v2403_v39 }
  0xb4   : > { %v1106_v28 = vpop.permute.xlu0 %1105  ;;  %v2409_v41 = vunpack.i.h.bf16 %v2407_v27  ;;  %v2408_v42 = vunpack.i.l.bf16 %v2407_v27  ;;  %v1186_v46 = vsel %vm1167_vm1, %v2936_v25, %v2374_v44 }
  0xb5   : > { %2212 = vmatprep.mubr.msk.f32.mxu1 %vm1391_vm6, %v1106_v28  ;;  %1091 = vrot.lane.b32.xlu1 %v3163_v7, %s2800_s10  ;;  %v1350_v30 = vsel %vm1332_vm7, %v1317_v29, %v1106_v28  ;;  %v1219_v62 = vsel %vm1200_vm2, %v1186_v46, %v2404_v37  ;;  %v2141_v7 = vld [vmem:[%s2900_s19 + $0x1b0] sm:$0xff] }
  0xb6   : > { %2611 = vrot.lane.b32.xlu0 %v3169_v11, %s2796_s9  ;;  %1610 = vmatmul.mubr.f32.gmra.mrb[2].mxu1 %v1350_v30  ;;  %v1236_v1 = vsel %vm1233_vm3, %v1203_v59, %v2408_v42  ;;  %v1252_v4 = vsel %vm1233_vm3, %v1219_v62, %v2409_v41  ;;  %v3330_v62 = vld [vmem:[%s2900_s19 + $0x90] sm:$0xff] }
  0xb7   : > { %v3250_v32 = vpop.permute.xlu1 %2416 }
  0xb8   : > { %v2412_v40 = vpop.permute.xlu0 %2411  ;;  %v2418_v13 = vunpack.i.l.bf16 %v3250_v32 }
  0xb9   : > { %2616 = vrot.lane.b32.xlu1 %v3183_v23, %s2798_s25  ;;  %v2414_v43 = vunpack.i.h.bf16 %v2412_v40  ;;  %v2413_v11 = vunpack.i.l.bf16 %v2412_v40  ;;  %v3312_v40 = vpack.i.bf16 %v2157_v31, %v2141_v7 }
  0xba   : > { %1123 = vrot.lane.b32.xlu0 %v2187_v35, %s2800_s10  ;;  %v1187_v18 = vsel %vm1167_vm1, %v2996_v50, %v2418_v13 }
  0xbb   : > { %v2427_v48 = vpop.permute.xlu1 %2426  ;;  %v1269_v25 = vsel %vm1266_vm4, %v1236_v1, %v2413_v11  ;;  %v1285_v5 = vsel %vm1266_vm4, %v1252_v4, %v2414_v43  ;;  %v1172_v4 = vsel %vm1167_vm1, %v2956_v33, %v2343_v51  ;;  %v2159_v51 = vld [vmem:[%s2900_s19 + $0x240] sm:$0xff] }
  0xbc   : > { %v2422_v0 = vpop.permute.xlu0 %2421  ;;  %v2429_v15 = vunpack.i.h.bf16 %v2427_v48  ;;  %v2428_v16 = vunpack.i.l.bf16 %v2427_v48 }
  0xbd   : > { %v2424_v36 = vunpack.i.h.bf16 %v2422_v0  ;;  %v2423_v38 = vunpack.i.l.bf16 %v2422_v0  ;;  %2626 = vrot.lane.b32.xlu1 %v3138_v55, %s2795_s27 }
  0xbe   : > { %2621 = vrot.lane.b32.xlu0 %v3258_v21, %s2797_s24  ;;  %v1220_v28 = vsel %vm1200_vm2, %v1187_v18, %v2429_v15 }
  0xbf   : > { %v1108_v6 = vpop.permute.xlu1 %1107  ;;  %v1302_v58 = vsel %vm1299_vm5, %v1269_v25, %v2423_v38  ;;  %v1318_v2 = vsel %vm1299_vm5, %v1285_v5, %v2424_v36  ;;  %v2419_v25 = vunpack.i.h.bf16 %v3250_v32 }
  0xc0   : > { %v1076_v8 = vpop.permute.xlu0 %1075  ;;  %2213 = vmatprep.mubr.msk.f32.mxu1 %vm1391_vm6, %v1108_v6  ;;  %v1351_v55 = vsel %vm1332_vm7, %v1318_v2, %v1108_v6  ;;  %v3342_v2 = vld [vmem:[%s2900_s19 + $0x110] sm:$0xff] }
  0xc1   : > { %2197 = vmatprep.mubr.msk.f32.mxu0 %vm1391_vm6, %v1076_v8  ;;  %2636 = vrot.lane.b32.xlu1 %v3209_v47, %s2796_s9  ;;  %v1335_v14 = vsel %vm1332_vm7, %v1302_v58, %v1076_v8  ;;  %v1171_v47 = vsel %vm1167_vm1, %v2993_v49, %v2339_v10  ;;  %v3355_v10 = vpack.i.bf16 %v3291_v17, %v3217_v61 }
  0xc2   : > { %2631 = vrot.lane.b32.xlu0 %v3274_v24, %s2799_s4  ;;  %1535 = vmatmul.mubr.f32.gmra.mrb[4].mxu0 %v1335_v14  ;;  %v1204_v27 = vsel %vm1200_vm2, %v1171_v47, %v2428_v16 }
  0xc3   : > { %1615 = vmatmul.mubr.f32.gmra.mrb[4].mxu1 %v1351_v55  ;;  %v2437_v57 = vpop.permute.xlu1 %2436 }
  0xc4   : > { %v2432_v19 = vpop.permute.xlu0 %2431  ;;  %v2439_v29 = vunpack.i.h.bf16 %v2437_v57  ;;  %v2438_v30 = vunpack.i.l.bf16 %v2437_v57  ;;  %v2142_v57 = vld [vmem:[%s2900_s19 + $0x1b8] sm:$0xff] }
  0xc5   : > { %v2434_v22 = vunpack.i.h.bf16 %v2432_v19  ;;  %v2433_v26 = vunpack.i.l.bf16 %v2432_v19  ;;  %1125 = vrot.lane.b32.xlu1 %v3291_v17, %s2800_s10  ;;  %v2158_v19 = vld [vmem:[%s2900_s19 + $0x238] sm:$0xff] }
  0xc6   : > { %1093 = vrot.lane.b32.xlu0 %v3217_v61, %s2800_s10  ;;  %v3368_v61 = vpack.i.bf16 %v2158_v19, %v2142_v57  ;;  %v2144_v19 = vld [vmem:[%s2900_s19 + $0x1c8] sm:$0xff] }
  0xc7   : > { %v1237_v49 = vsel %vm1233_vm3, %v1204_v27, %v2433_v26  ;;  %v1253_v50 = vsel %vm1233_vm3, %v1220_v28, %v2434_v22  ;;  %v2447_v44 = vpop.permute.xlu1 %2446  ;;  %v2344_v27 = vunpack.i.h.bf16 %v3132_v52  ;;  %v3384_v52 = vld [vmem:[%s2900_s19 + $0xa8] sm:$0xff] }
  0xc8   : > { %v2442_v35 = vpop.permute.xlu0 %2441  ;;  %v1270_v41 = vsel %vm1266_vm4, %v1237_v49, %v2438_v30  ;;  %v1286_v42 = vsel %vm1266_vm4, %v1253_v50, %v2439_v29  ;;  %v2448_v59 = vunpack.i.l.bf16 %v2447_v44  ;;  %v3381_v49 = vld [vmem:[%s2900_s19 + $0x118] sm:$0xff] }
  0xc9   : > { %v2444_v37 = vunpack.i.h.bf16 %v2442_v35  ;;  %v2443_v39 = vunpack.i.l.bf16 %v2442_v35  ;;  %2646 = vrot.lane.b32.xlu1 %v3294_v20, %s2797_s24  ;;  %v3387_v35 = vld [vmem:[%s2900_s19 + $0x98] sm:$0xff] }
  0xca   : > { %2641 = vrot.lane.b32.xlu0 %v3223_v9, %s2798_s25  ;;  %v1205_v5 = vsel %vm1200_vm2, %v1172_v4, %v2448_v59 }
  0xcb   : > { %v1110_v43 = vpop.permute.xlu1 %1109  ;;  %v1303_v11 = vsel %vm1299_vm5, %v1270_v41, %v2443_v39  ;;  %v1319_v45 = vsel %vm1299_vm5, %v1286_v42, %v2444_v37 }
  0xcc   : > { %v1078_v46 = vpop.permute.xlu0 %1077  ;;  %2214 = vmatprep.mubr.msk.f32.mxu1 %vm1391_vm6, %v1110_v43  ;;  %v1352_v48 = vsel %vm1332_vm7, %v1319_v45, %v1110_v43  ;;  %v2695_v45 = vpack.i.bf16 %v3342_v2, %v3330_v62 }
  0xcd   : > { %2198 = vmatprep.mubr.msk.f32.mxu0 %vm1391_vm6, %v1078_v46  ;;  %2656 = vrot.lane.b32.xlu1 %v3312_v40, %s2799_s4  ;;  %v1336_v54 = vsel %vm1332_vm7, %v1303_v11, %v1078_v46 }
  0xce   : > { %2651 = vrot.lane.b32.xlu0 %v3183_v23, %s2795_s27  ;;  %1540 = vmatmul.mubr.f32.gmra.mrb[6].mxu0 %v1336_v54  ;;  %v2449_v23 = vunpack.i.h.bf16 %v2447_v44 }
  0xcf   : > { %1620 = vmatmul.mubr.f32.gmra.mrb[6].mxu1 %v1352_v48  ;;  %v2457_v0 = vpop.permute.xlu1 %2456 }
  0xd0   : > { %v2452_v1 = vpop.permute.xlu0 %2451  ;;  %v2458_v36 = vunpack.i.l.bf16 %v2457_v0  ;;  %v2459_v15 = vunpack.i.h.bf16 %v2457_v0 }
  0xd1   : > { %v2453_v38 = vunpack.i.l.bf16 %v2452_v1  ;;  %1095 = vrot.lane.b32.xlu1 %v3330_v62, %s2800_s10  ;;  %v2454_v33 = vunpack.i.h.bf16 %v2452_v1 }
  0xd2   : > { %2661 = vrot.lane.b32.xlu0 %v3258_v21, %s2796_s9  ;;  %v1188_v21 = vsel %vm1167_vm1, %v2959_v34, %v2419_v25 }
  0xd3   : > { %v1238_v6 = vsel %vm1233_vm3, %v1205_v5, %v2453_v38  ;;  %v2467_v58 = vpop.permute.xlu1 %2466  ;;  %v1221_v14 = vsel %vm1200_vm2, %v1188_v21, %v2449_v23  ;;  %v191_v21 = vld [vmem:[%s2900_s19 + $0xb0] sm:$0xff] }
  0xd4   : > { %v2468_v8 = vunpack.i.l.bf16 %v2467_v58  ;;  %v3344_v55 = vpop.permute.xlu0 %2461  ;;  %v1271_v32 = vsel %vm1266_vm4, %v1238_v6, %v2458_v36  ;;  %v1254_v47 = vsel %vm1233_vm3, %v1221_v14, %v2454_v33  ;;  %v2469_v18 = vunpack.i.h.bf16 %v2467_v58  ;;  %v2175_v33 = vld [vmem:[%s2900_s19 + $0xa0] sm:$0xff] }
  0xd5   : > { %2666 = vrot.lane.b32.xlu1 %v3274_v24, %s2798_s25  ;;  %v1287_v26 = vsel %vm1266_vm4, %v1254_v47, %v2459_v15  ;;  %v2463_v7 = vunpack.i.l.bf16 %v3344_v55  ;;  %v2160_v47 = vld [vmem:[%s2900_s19 + $0x248] sm:$0xff] }
  0xd6   : > { %1127 = vrot.lane.b32.xlu0 %v3342_v2, %s2800_s10  ;;  %v1304_v13 = vsel %vm1299_vm5, %v1271_v32, %v2468_v8  ;;  %v1320_v29 = vsel %vm1299_vm5, %v1287_v26, %v2469_v18  ;;  %v2464_v8 = vunpack.i.h.bf16 %v3344_v55 }
  0xd7   : > { %v1080_v16 = vpop.permute.xlu1 %1079  ;;  %v1189_v46 = vsel %vm1167_vm1, %v3384_v52, %v2463_v7 }
  0xd8   : > { %v2472_v22 = vpop.permute.xlu0 %2471  ;;  %2199 = vmatprep.mubr.msk.f32.mxu0 %vm1391_vm6, %v1080_v16  ;;  %v1337_v34 = vsel %vm1332_vm7, %v1304_v13, %v1080_v16 }
  0xd9   : > { %2676 = vrot.lane.b32.xlu1 %v3223_v9, %s2795_s27  ;;  %1545 = vmatmul.mubr.f32.gmra.mrb[8].mxu0 %v1337_v34  ;;  %v2473_v30 = vunpack.i.l.bf16 %v2472_v22  ;;  %v2474_v50 = vunpack.i.h.bf16 %v2472_v22  ;;  %v1190_v22 = vsel %vm1167_vm1, %v191_v21, %v2464_v8  ;;  %v2353_v8 = vunpack.i.l.bf16 %v3152_v60 }
  0xda   : > { %2671 = vrot.lane.b32.xlu0 %v3355_v10, %s2797_s24 }
  0xdb   : > { %v2477_v17 = vpop.permute.xlu1 %2476  ;;  %v1222_v54 = vsel %vm1200_vm2, %v1189_v46, %v2474_v50 }
  0xdc   : > { %v1112_v28 = vpop.permute.xlu0 %1111  ;;  %v2478_v31 = vunpack.i.l.bf16 %v2477_v17  ;;  %v2479_v37 = vunpack.i.h.bf16 %v2477_v17  ;;  %v2191_v17 = vld [vmem:[%s2900_s19 + $0x120] sm:$0xff] }
  0xdd   : > { %2215 = vmatprep.mubr.msk.f32.mxu1 %vm1391_vm6, %v1112_v28  ;;  %2686 = vrot.lane.b32.xlu1 %v3294_v20, %s2796_s9  ;;  %v1353_v9 = vsel %vm1332_vm7, %v1320_v29, %v1112_v28  ;;  %v1173_v20 = vsel %vm1167_vm1, %v3029_v63, %v2344_v27  ;;  %v2143_v63 = vld [vmem:[%s2900_s19 + $0x1c0] sm:$0xff]  ;;  %v2725_v29 = vpack.i.bf16 %v2160_v47, %v2144_v19 }
  0xde   : > { %2681 = vrot.lane.b32.xlu0 %v3368_v61, %s2799_s4  ;;  %1625 = vmatmul.mubr.f32.gmra.mrb[8].mxu1 %v1353_v9  ;;  %v1206_v42 = vsel %vm1200_vm2, %v1173_v20, %v2473_v30  ;;  %v1255_v1 = vsel %vm1233_vm3, %v1222_v54, %v2479_v37  ;;  %v2705_v25 = vpack.i.bf16 %v2159_v51, %v2143_v63 }
  0xdf   : > { %v2487_v44 = vpop.permute.xlu1 %2486  ;;  %v1239_v48 = vsel %vm1233_vm3, %v1206_v42, %v2478_v31 }
  0xe0   : > { %v2488_v39 = vunpack.i.l.bf16 %v2487_v44  ;;  %v2482_v41 = vpop.permute.xlu0 %2481  ;;  %v2489_v4 = vunpack.i.h.bf16 %v2487_v44 }
  0xe1   : > { %v2484_v43 = vunpack.i.h.bf16 %v2482_v41  ;;  %v2483_v11 = vunpack.i.l.bf16 %v2482_v41  ;;  %1129 = vrot.lane.b32.xlu1 %v3381_v49, %s2800_s10  ;;  %v2349_v41 = vunpack.i.h.bf16 %v3142_v56 }
  0xe2   : > { %1097 = vrot.lane.b32.xlu0 %v3387_v35, %s2800_s10 }
  0xe3   : > { %v1082_v59 = vpop.permute.xlu1 %1081  ;;  %v1272_v0 = vsel %vm1266_vm4, %v1239_v48, %v2483_v11  ;;  %v1288_v5 = vsel %vm1266_vm4, %v1255_v1, %v2484_v43 }
  0xe4   : > { %v2492_v36 = vpop.permute.xlu0 %2491  ;;  %2200 = vmatprep.mubr.msk.f32.mxu0 %vm1391_vm6, %v1082_v59  ;;  %v1305_v62 = vsel %vm1299_vm5, %v1272_v0, %v2488_v39  ;;  %v1321_v58 = vsel %vm1299_vm5, %v1288_v5, %v2489_v4 }
  0xe5   : > { %2696 = vrot.lane.b32.xlu1 %v2695_v45, %s2797_s24  ;;  %v1338_v38 = vsel %vm1332_vm7, %v1305_v62, %v1082_v59  ;;  %v2494_v13 = vunpack.i.h.bf16 %v2492_v36  ;;  %v2493_v14 = vunpack.i.l.bf16 %v2492_v36  ;;  %v2192_v45 = vld [vmem:[%s2900_s19 + $0x128] sm:$0xff] }
  0xe6   : > { %2691 = vrot.lane.b32.xlu0 %v3312_v40, %s2798_s25  ;;  %1550 = vmatmul.mubr.f32.gmra.mrb[10].mxu0 %v1338_v38  ;;  %v2348_v40 = vunpack.i.l.bf16 %v3142_v56  ;;  %v1175_v56 = vsel %vm1167_vm1, %v3044_v3, %v2349_v41 }
  0xe7   : > { %v2497_v23 = vpop.permute.xlu1 %2496  ;;  %v1223_v27 = vsel %vm1200_vm2, %v1190_v22, %v2494_v13 }
  0xe8   : > { %v1114_v6 = vpop.permute.xlu0 %1113  ;;  %v2499_v16 = vunpack.i.h.bf16 %v2497_v23  ;;  %v2498_v57 = vunpack.i.l.bf16 %v2497_v23  ;;  %v1174_v55 = vsel %vm1167_vm1, %v3009_v53, %v2348_v40  ;;  %v2720_v53 = vpack.i.bf16 %v3381_v49, %v3387_v35  ;;  %v192_v35 = vld [vmem:[%s2900_s19 + $0xb8] sm:$0xff] }
  0xe9   : > { %2216 = vmatprep.mubr.msk.f32.mxu1 %vm1391_vm6, %v1114_v6  ;;  %2706 = vrot.lane.b32.xlu1 %v2705_v25, %s2799_s4  ;;  %v1354_v2 = vsel %vm1332_vm7, %v1321_v58, %v1114_v6  ;;  %v1207_v26 = vsel %vm1200_vm2, %v1174_v55, %v2493_v14 }
  0xea   : > { %2701 = vrot.lane.b32.xlu0 %v3274_v24, %s2795_s27  ;;  %1630 = vmatmul.mubr.f32.gmra.mrb[10].mxu1 %v1354_v2  ;;  %v1240_v30 = vsel %vm1233_vm3, %v1207_v26, %v2498_v57  ;;  %v1256_v9 = vsel %vm1233_vm3, %v1223_v27, %v2499_v16  ;;  %v1176_v16 = vsel %vm1167_vm1, %v3063_v12, %v2353_v8 }
  0xeb   : > { %v3422_v32 = vpop.permute.xlu1 %2506 }
  0xec   : > { %v2502_v15 = vpop.permute.xlu0 %2501  ;;  %v2508_v42 = vunpack.i.l.bf16 %v3422_v32  ;;  %v2509_v47 = vunpack.i.h.bf16 %v3422_v32 }
  0xed   : > { %1099 = vrot.lane.b32.xlu1 %v2175_v33, %s2800_s10  ;;  %v2504_v24 = vunpack.i.h.bf16 %v2502_v15  ;;  %v2503_v18 = vunpack.i.l.bf16 %v2502_v15 }
  0xee   : > { %2711 = vrot.lane.b32.xlu0 %v3355_v10, %s2796_s9  ;;  %v1191_v63 = vsel %vm1167_vm1, %v192_v35, %v2508_v42  ;;  %v178_v42 = vld [vmem:[%s2900_s19 + $0x48] sm:$0xff]  ;;  %s161_s9 = sand.u32 1, %s2784_s13  }
  0xef   : > { %v2517_v34 = vpop.permute.xlu1 %2516  ;;  %v1273_v10 = vsel %vm1266_vm4, %v1240_v30, %v2503_v18  ;;  %v1289_v50 = vsel %vm1266_vm4, %v1256_v9, %v2504_v24  ;;  %v193_v18 = vld [vmem:[%s2900_s19 + $0xc0] sm:$0xff]  ;;  %s1999_s20 = sshll.u32 %s161_s9, 6 }
  0xf0   : > { %v2512_v28 = vpop.permute.xlu0 %2511  ;;  %v2519_v43 = vunpack.i.h.bf16 %v2517_v34  ;;  %v2518_v11 = vunpack.i.l.bf16 %v2517_v34 }
  0xf1   : > { %v2514_v7 = vunpack.i.h.bf16 %v2512_v28  ;;  %v2513_v31 = vunpack.i.l.bf16 %v2512_v28  ;;  %2716 = vrot.lane.b32.xlu1 %v3368_v61, %s2798_s25  ;;  %v1192_v28 = vsel %vm1167_vm1, %v193_v18, %v2509_v47  ;;  %v195_v47 = vld [vmem:[%s2900_s19 + $0xd0] sm:$0xff]  ;;  %s2232_s25 = sshll.u32 %s2846_s16, 10  ;;  %s3778_s16 = scalar_lea.sflag [#allocation5], %s161_s9 }
  0xf2   : > { %1131 = vrot.lane.b32.xlu0 %v2191_v17, %s2800_s10  ;;  %v1208_v59 = vsel %vm1200_vm2, %v1175_v56, %v2518_v11  ;;  %v1224_v0 = vsel %vm1200_vm2, %v1191_v63, %v2519_v43  ;;  %s3768_s30 = scalar_lea.hbm %s3822_s3, %s2232_s25 }
  0xf3   : > { %v1116_v44 = vpop.permute.xlu1 %1115  ;;  %v1306_v20 = vsel %vm1299_vm5, %v1273_v10, %v2513_v31  ;;  %v1322_v37 = vsel %vm1299_vm5, %v1289_v50, %v2514_v7 }
  0xf4   : > { %v1084_v39 = vpop.permute.xlu0 %1083  ;;  %2217 = vmatprep.mubr.msk.f32.mxu1 %vm1391_vm6, %v1116_v44  ;;  %v1355_v61 = vsel %vm1332_vm7, %v1322_v37, %v1116_v44 }
  0xf5   : > { %2201 = vmatprep.mubr.msk.f32.mxu0 %vm1391_vm6, %v1084_v39  ;;  %2726 = vrot.lane.b32.xlu1 %v2725_v29, %s2799_s4  ;;  %v1339_v49 = vsel %vm1332_vm7, %v1306_v20, %v1084_v39 }
  0xf6   : > { %2721 = vrot.lane.b32.xlu0 %v2720_v53, %s2797_s24  ;;  %1555 = vmatmul.mubr.f32.gmra.mrb[12].mxu0 %v1339_v49  ;;  %v194_v49 = vld [vmem:[%s2900_s19 + $0xc8] sm:$0xff]  ;;  %s3645_s24 = scalar_lea.vmem [#allocation4], %s1999_s20 }
  0xf7   : > { %1635 = vmatmul.mubr.f32.gmra.mrb[12].mxu1 %v1355_v61  ;;  %v2527_v46 = vpop.permute.xlu1 %2526  ;;  %s1933_s26 = sshll.u32 %s3645_s24, 4  ;;  %s3770_s26 = int_to_ptr.vmem [resolvable:$true] %s1933_s26 }
  0xf8   : > { %v2522_v48 = vpop.permute.xlu0 %2521  ;;  %v2529_v1 = vunpack.i.h.bf16 %v2527_v46  ;;  %v2528_v4 = vunpack.i.l.bf16 %v2527_v46  ;;  %s2730_s4 = scalar_lea.vmem %s3770_s26, 1024  ;;  %p2737_p0 = scmp.lt.s32.totalorder %s3770_s26, %s2735_s6 }
  0xf9   : > { %v2524_v51 = vunpack.i.h.bf16 %v2522_v48  ;;  %v2523_v54 = vunpack.i.l.bf16 %v2522_v48  ;;  %1133 = vrot.lane.b32.xlu1 %v2192_v45, %s2800_s10  ;;  %p2731_p11 = scmp.ne.s32.totalorder %s3770_s26, %s2730_s4  ;;  %p2738_p1 = scmp.lt.s32.totalorder %s2736_s7, %s2730_s4 }
  0xfa   : > { %1101 = vrot.lane.b32.xlu0 %v3384_v52, %s2800_s10 }
  0xfb   : > { %v1241_v36 = vsel %vm1233_vm3, %v1208_v59, %v2523_v54  ;;  %v1257_v62 = vsel %vm1233_vm3, %v1224_v0, %v2524_v51  ;;  %v2537_v3 = vpop.permute.xlu1 %2536  ;;  %p2732_p12 = pnand %p2731_p11, %p2863_p5  ;;  %p2739_p2 = por %p2738_p1, %p2737_p0 }
  0xfc   : > { %v2532_v38 = vpop.permute.xlu0 %2531  ;;  %v1274_v23 = vsel %vm1266_vm4, %v1241_v36, %v2528_v4  ;;  %v1290_v6 = vsel %vm1266_vm4, %v1257_v62, %v2529_v1  ;;  %v2538_v13 = vunpack.i.l.bf16 %v2537_v3  ;;  %v2539_v60 = vunpack.i.h.bf16 %v2537_v3 }
  0xfd   : > { %v2534_v25 = vunpack.i.h.bf16 %v2532_v38  ;;  %v2533_v5 = vunpack.i.l.bf16 %v2532_v38  ;;  %p2733_p13 = pneg %p2732_p12 }
  0xfe   : > { %v1209_v24 = vsel %vm1200_vm2, %v1176_v16, %v2538_v13  ;;  %v1225_v29 = vsel %vm1200_vm2, %v1192_v28, %v2539_v60 }
  0xff   : > { %v1118_v58 = vpop.permute.xlu1 %1117  ;;  %v1307_v2 = vsel %vm1299_vm5, %v1274_v23, %v2533_v5  ;;  %v1323_v33 = vsel %vm1299_vm5, %v1290_v6, %v2534_v25  ;;  %p2740_p3 = pnand %p2739_p2, %p2733_p13 }
 0x100   : > { %v1086_v40 = vpop.permute.xlu0 %1085  ;;  %2218 = vmatprep.mubr.msk.f32.mxu1 %vm1391_vm6, %v1118_v58  ;;  %v1356_v52 = vsel %vm1332_vm7, %v1323_v33, %v1118_v58 }
 0x101   : > { %2202 = vmatprep.mubr.msk.f32.mxu0 %vm1391_vm6, %v1086_v40  ;;  %v1340_v21 = vsel %vm1332_vm7, %v1307_v2, %v1086_v40  ;;  %1640 = vmatmul.mubr.f32.gmra.mrb[14].mxu1 %v1356_v52  ;;  %v179_v52 = vld [vmem:[%s2900_s19 + $0x50] sm:$0xff] }
 0x102   : > { %1560 = vmatmul.mubr.f32.gmra.mrb[14].mxu0 %v1340_v21 }
 0x103   : > { %v2547_v14 = vpop.permute.xlu1 %2546 }
 0x104   : > { %v2542_v15 = vpop.permute.xlu0 %2541  ;;  %v2548_v57 = vunpack.i.l.bf16 %v2547_v14  ;;  %v2549_v30 = vunpack.i.h.bf16 %v2547_v14 }
 0x105   : > { %v2543_v19 = vunpack.i.l.bf16 %v2542_v15  ;;  %v2544_v34 = vunpack.i.h.bf16 %v2542_v15 }
 0x107   : > { %v1242_v55 = vsel %vm1233_vm3, %v1209_v24, %v2543_v19  ;;  %v2557_v22 = vpop.permute.xlu1 %2556  ;;  %v1258_v9 = vsel %vm1233_vm3, %v1225_v29, %v2544_v34 }
 0x108   : > { %v2558_v17 = vunpack.i.l.bf16 %v2557_v22  ;;  %v2552_v26 = vpop.permute.xlu0 %2551  ;;  %v1275_v27 = vsel %vm1266_vm4, %v1242_v55, %v2548_v57  ;;  %v2559_v7 = vunpack.i.h.bf16 %v2557_v22  ;;  %v1291_v50 = vsel %vm1266_vm4, %v1258_v9, %v2549_v30 }
 0x109   : > { %v2554_v39 = vunpack.i.h.bf16 %v2552_v26  ;;  %v2553_v61 = vunpack.i.l.bf16 %v2552_v26 }
 0x10a   : > { %v1308_v12 = vsel %vm1299_vm5, %v1275_v27, %v2558_v17  ;;  %v1324_v20 = vsel %vm1299_vm5, %v1291_v50, %v2559_v7 }
 0x10b   : > { %v1088_v32 = vpop.permute.xlu1 %1087  ;;  %v1177_v63 = vsel %vm1167_vm1, %v178_v42, %v2553_v61  ;;  %v1193_v51 = vsel %vm1167_vm1, %v194_v49, %v2554_v39  ;;  %v180_v61 = vld [vmem:[%s2900_s19 + $0x58] sm:$0xff] }
 0x10c   : > { %v2562_v31 = vpop.permute.xlu0 %2561  ;;  %2203 = vmatprep.mubr.msk.f32.mxu0 %vm1391_vm6, %v1088_v32  ;;  %v1341_v53 = vsel %vm1332_vm7, %v1308_v12, %v1088_v32 }
 0x10d   : > { %1565 = vmatmul.mubr.f32.gmra.mrb[16].mxu0 %v1341_v53  ;;  %v2564_v35 = vunpack.i.h.bf16 %v2562_v31  ;;  %v2563_v43 = vunpack.i.l.bf16 %v2562_v31 }
 0x10f   : > { %v2567_v10 = vpop.permute.xlu1 %2566  ;;  %v1210_v59 = vsel %vm1200_vm2, %v1177_v63, %v2563_v43  ;;  %v1226_v0 = vsel %vm1200_vm2, %v1193_v51, %v2564_v35 }
 0x110   : > { %v1120_v44 = vpop.permute.xlu0 %1119  ;;  %v2569_v45 = vunpack.i.h.bf16 %v2567_v10  ;;  %v2568_v46 = vunpack.i.l.bf16 %v2567_v10 }
 0x111   : > { %2219 = vmatprep.mubr.msk.f32.mxu1 %vm1391_vm6, %v1120_v44  ;;  %v1357_v37 = vsel %vm1332_vm7, %v1324_v20, %v1120_v44 }
 0x112   : > { %1645 = vmatmul.mubr.f32.gmra.mrb[16].mxu1 %v1357_v37  ;;  %v1243_v4 = vsel %vm1233_vm3, %v1210_v59, %v2568_v46  ;;  %v1259_v36 = vsel %vm1233_vm3, %v1226_v0, %v2569_v45 }
 0x113   : > { %v2577_v41 = vpop.permute.xlu1 %2576 }
 0x114   : > { %v2572_v11 = vpop.permute.xlu0 %2571  ;;  %v2578_v33 = vunpack.i.l.bf16 %v2577_v41  ;;  %v2579_v57 = vunpack.i.h.bf16 %v2577_v41  ;;  %v196_v41 = vld [vmem:[%s2900_s19 + $0xd8] sm:$0xff] }
 0x115   : > { %v2574_v48 = vunpack.i.h.bf16 %v2572_v11  ;;  %v2573_v56 = vunpack.i.l.bf16 %v2572_v11 }
 0x116   : > { %v1178_v14 = vsel %vm1167_vm1, %v179_v52, %v2578_v33  ;;  %v1194_v26 = vsel %vm1167_vm1, %v195_v47, %v2579_v57  ;;  %v181_v33 = vld [vmem:[%s2900_s19 + $0x60] sm:$0xff] }
 0x117   : > { %v2587_v54 = vpop.permute.xlu1 %2586  ;;  %v1276_v38 = vsel %vm1266_vm4, %v1243_v4, %v2573_v56  ;;  %v1292_v25 = vsel %vm1266_vm4, %v1259_v36, %v2574_v48  ;;  %v197_v57 = vld [vmem:[%s2900_s19 + $0xe0] sm:$0xff] }
 0x118   : > { %v2582_v1 = vpop.permute.xlu0 %2581  ;;  %v2588_v8 = vunpack.i.l.bf16 %v2587_v54  ;;  %v2589_v24 = vunpack.i.h.bf16 %v2587_v54 }
 0x119   : > { %v2584_v62 = vunpack.i.h.bf16 %v2582_v1  ;;  %v2583_v3 = vunpack.i.l.bf16 %v2582_v1 }
 0x11a   : > { %v1211_v19 = vsel %vm1200_vm2, %v1178_v14, %v2588_v8  ;;  %v1227_v28 = vsel %vm1200_vm2, %v1194_v26, %v2589_v24 }
 0x11b   : > { %v1122_v5 = vpop.permute.xlu1 %1121  ;;  %v1309_v23 = vsel %vm1299_vm5, %v1276_v38, %v2583_v3  ;;  %v1325_v6 = vsel %vm1299_vm5, %v1292_v25, %v2584_v62 }
 0x11c   : > { %v1090_v58 = vpop.permute.xlu0 %1089  ;;  %2220 = vmatprep.mubr.msk.f32.mxu1 %vm1391_vm6, %v1122_v5  ;;  %v1358_v2 = vsel %vm1332_vm7, %v1325_v6, %v1122_v5 }
 0x11d   : > { %2204 = vmatprep.mubr.msk.f32.mxu0 %vm1391_vm6, %v1090_v58  ;;  %v1342_v40 = vsel %vm1332_vm7, %v1309_v23, %v1090_v58  ;;  %1650 = vmatmul.mubr.f32.gmra.mrb[18].mxu1 %v1358_v2 }
 0x11e   : > { %1570 = vmatmul.mubr.f32.gmra.mrb[18].mxu0 %v1342_v40 }
 0x11f   : > { %v2597_v21 = vpop.permute.xlu1 %2596 }
 0x120   : > { %v2592_v13 = vpop.permute.xlu0 %2591  ;;  %v2598_v15 = vunpack.i.l.bf16 %v2597_v21  ;;  %v2599_v12 = vunpack.i.h.bf16 %v2597_v21 }
 0x121   : > { %v2593_v16 = vunpack.i.l.bf16 %v2592_v13  ;;  %v2594_v55 = vunpack.i.h.bf16 %v2592_v13 }
 0x123   : > { %v1244_v18 = vsel %vm1233_vm3, %v1211_v19, %v2593_v16  ;;  %v2607_v60 = vpop.permute.xlu1 %2606  ;;  %v1260_v30 = vsel %vm1233_vm3, %v1227_v28, %v2594_v55 }
 0x124   : > { %v2608_v22 = vunpack.i.l.bf16 %v2607_v60  ;;  %v2602_v34 = vpop.permute.xlu0 %2601  ;;  %v1277_v17 = vsel %vm1266_vm4, %v1244_v18, %v2598_v15  ;;  %v2609_v32 = vunpack.i.h.bf16 %v2607_v60  ;;  %v1293_v53 = vsel %vm1266_vm4, %v1260_v30, %v2599_v12 }
 0x125   : > { %v2604_v20 = vunpack.i.h.bf16 %v2602_v34  ;;  %v2603_v37 = vunpack.i.l.bf16 %v2602_v34 }
 0x126   : > { %v1310_v27 = vsel %vm1299_vm5, %v1277_v17, %v2608_v22  ;;  %v1326_v50 = vsel %vm1299_vm5, %v1293_v53, %v2609_v32 }
 0x127   : > { %v1092_v29 = vpop.permute.xlu1 %1091  ;;  %v1179_v48 = vsel %vm1167_vm1, %v180_v61, %v2603_v37  ;;  %v1195_v56 = vsel %vm1167_vm1, %v196_v41, %v2604_v20  ;;  %v182_v37 = vld [vmem:[%s2900_s19 + $0x68] sm:$0xff] }
 0x128   : > { %v2612_v9 = vpop.permute.xlu0 %2611  ;;  %2205 = vmatprep.mubr.msk.f32.mxu0 %vm1391_vm6, %v1092_v29  ;;  %v1343_v7 = vsel %vm1332_vm7, %v1310_v27, %v1092_v29 }
 0x129   : > { %1575 = vmatmul.mubr.f32.gmra.mrb[20].mxu0 %v1343_v7  ;;  %v2614_v42 = vunpack.i.h.bf16 %v2612_v9  ;;  %v2613_v49 = vunpack.i.l.bf16 %v2612_v9 }
 0x12b   : > { %v2617_v31 = vpop.permute.xlu1 %2616  ;;  %v1212_v51 = vsel %vm1200_vm2, %v1179_v48, %v2613_v49  ;;  %v1228_v54 = vsel %vm1200_vm2, %v1195_v56, %v2614_v42 }
 0x12c   : > { %v1124_v10 = vpop.permute.xlu0 %1123  ;;  %v2619_v43 = vunpack.i.h.bf16 %v2617_v31  ;;  %v2618_v11 = vunpack.i.l.bf16 %v2617_v31 }
 0x12d   : > { %2221 = vmatprep.mubr.msk.f32.mxu1 %vm1391_vm6, %v1124_v10  ;;  %v1359_v44 = vsel %vm1332_vm7, %v1326_v50, %v1124_v10 }
 0x12e   : > { %1655 = vmatmul.mubr.f32.gmra.mrb[20].mxu1 %v1359_v44  ;;  %v1245_v0 = vsel %vm1233_vm3, %v1212_v51, %v2618_v11  ;;  %v1261_v1 = vsel %vm1233_vm3, %v1228_v54, %v2619_v43 }
 0x12f   : > { %v2627_v39 = vpop.permute.xlu1 %2626 }
 0x130   : > { %v2622_v35 = vpop.permute.xlu0 %2621  ;;  %v2628_v58 = vunpack.i.l.bf16 %v2627_v39  ;;  %v2629_v15 = vunpack.i.h.bf16 %v2627_v39  ;;  %v198_v39 = vld [vmem:[%s2900_s19 + $0xe8] sm:$0xff] }
 0x131   : > { %v2624_v45 = vunpack.i.h.bf16 %v2622_v35  ;;  %v2623_v46 = vunpack.i.l.bf16 %v2622_v35 }
 0x132   : > { %v1180_v21 = vsel %vm1167_vm1, %v181_v33, %v2628_v58  ;;  %v1196_v34 = vsel %vm1167_vm1, %v197_v57, %v2629_v15  ;;  %v183_v58 = vld [vmem:[%s2900_s19 + $0x70] sm:$0xff] }
 0x133   : > { %v2637_v63 = vpop.permute.xlu1 %2636  ;;  %v1278_v62 = vsel %vm1266_vm4, %v1245_v0, %v2623_v46  ;;  %v1294_v3 = vsel %vm1266_vm4, %v1261_v1, %v2624_v45  ;;  %v199_v15 = vld [vmem:[%s2900_s19 + $0xf0] sm:$0xff] }
 0x134   : > { %v2632_v59 = vpop.permute.xlu0 %2631  ;;  %v2638_v40 = vunpack.i.l.bf16 %v2637_v63  ;;  %v2639_v19 = vunpack.i.h.bf16 %v2637_v63 }
 0x135   : > { %v2634_v4 = vunpack.i.h.bf16 %v2632_v59  ;;  %v2633_v36 = vunpack.i.l.bf16 %v2632_v59 }
 0x136   : > { %v1213_v16 = vsel %vm1200_vm2, %v1180_v21, %v2638_v40  ;;  %v1229_v26 = vsel %vm1200_vm2, %v1196_v34, %v2639_v19 }
 0x137   : > { %v1126_v38 = vpop.permute.xlu1 %1125  ;;  %v1311_v25 = vsel %vm1299_vm5, %v1278_v62, %v2633_v36  ;;  %v1327_v5 = vsel %vm1299_vm5, %v1294_v3, %v2634_v4 }
 0x138   : > { %v1094_v23 = vpop.permute.xlu0 %1093  ;;  %2222 = vmatprep.mubr.msk.f32.mxu1 %vm1391_vm6, %v1126_v38  ;;  %v1360_v6 = vsel %vm1332_vm7, %v1327_v5, %v1126_v38 }
 0x139   : > { %2206 = vmatprep.mubr.msk.f32.mxu0 %vm1391_vm6, %v1094_v23  ;;  %v1344_v2 = vsel %vm1332_vm7, %v1311_v25, %v1094_v23  ;;  %1660 = vmatmul.mubr.f32.gmra.mrb[22].mxu1 %v1360_v6 }
 0x13a   : > { %1580 = vmatmul.mubr.f32.gmra.mrb[22].mxu0 %v1344_v2 }
 0x13b   : > { %v2647_v52 = vpop.permute.xlu1 %2646 }
 0x13c   : > { %v2642_v8 = vpop.permute.xlu0 %2641  ;;  %v2648_v13 = vunpack.i.l.bf16 %v2647_v52  ;;  %v2649_v27 = vunpack.i.h.bf16 %v2647_v52 }
 0x13d   : > { %v2643_v14 = vunpack.i.l.bf16 %v2642_v8  ;;  %v2644_v18 = vunpack.i.h.bf16 %v2642_v8 }
 0x13f   : > { %v1246_v47 = vsel %vm1233_vm3, %v1213_v16, %v2643_v14  ;;  %v2657_v24 = vpop.permute.xlu1 %2656  ;;  %v1262_v12 = vsel %vm1233_vm3, %v1229_v26, %v2644_v18 }
 0x140   : > { %v2658_v60 = vunpack.i.l.bf16 %v2657_v24  ;;  %v2652_v55 = vpop.permute.xlu0 %2651  ;;  %v1279_v22 = vsel %vm1266_vm4, %v1246_v47, %v2648_v13  ;;  %v2659_v29 = vunpack.i.h.bf16 %v2657_v24  ;;  %v1295_v7 = vsel %vm1266_vm4, %v1262_v12, %v2649_v27 }
 0x141   : > { %v2654_v50 = vunpack.i.h.bf16 %v2652_v55  ;;  %v2653_v44 = vunpack.i.l.bf16 %v2652_v55 }
 0x142   : > { %v1312_v17 = vsel %vm1299_vm5, %v1279_v22, %v2658_v60  ;;  %v1328_v53 = vsel %vm1299_vm5, %v1295_v7, %v2659_v29 }
 0x143   : > { %v1096_v28 = vpop.permute.xlu1 %1095  ;;  %v1181_v45 = vsel %vm1167_vm1, %v182_v37, %v2653_v44  ;;  %v1197_v46 = vsel %vm1167_vm1, %v198_v39, %v2654_v50  ;;  %v200_v50 = vld [vmem:[%s2900_s19 + $0xf8] sm:$0xff] }
 0x144   : > { %v2662_v30 = vpop.permute.xlu0 %2661  ;;  %2207 = vmatprep.mubr.msk.f32.mxu0 %vm1391_vm6, %v1096_v28  ;;  %v1345_v32 = vsel %vm1332_vm7, %v1312_v17, %v1096_v28 }
 0x145   : > { %1585 = vmatmul.mubr.f32.gmra.mrb[24].mxu0 %v1345_v32  ;;  %v2664_v61 = vunpack.i.h.bf16 %v2662_v30  ;;  %v2663_v41 = vunpack.i.l.bf16 %v2662_v30 }
 0x147   : > { %v2667_v9 = vpop.permute.xlu1 %2666  ;;  %v1214_v56 = vsel %vm1200_vm2, %v1181_v45, %v2663_v41  ;;  %v1230_v63 = vsel %vm1200_vm2, %v1197_v46, %v2664_v61 }
 0x148   : > { %v1128_v31 = vpop.permute.xlu0 %1127  ;;  %v2669_v49 = vunpack.i.h.bf16 %v2667_v9  ;;  %v2668_v35 = vunpack.i.l.bf16 %v2667_v9 }
 0x149   : > { %2223 = vmatprep.mubr.msk.f32.mxu1 %vm1391_vm6, %v1128_v31  ;;  %v1361_v10 = vsel %vm1332_vm7, %v1328_v53, %v1128_v31 }
 0x14a   : > { %1665 = vmatmul.mubr.f32.gmra.mrb[24].mxu1 %v1361_v10  ;;  %v1247_v54 = vsel %vm1233_vm3, %v1214_v56, %v2668_v35  ;;  %v1263_v59 = vsel %vm1233_vm3, %v1230_v63, %v2669_v49  ;;  %v184_v10 = vld [vmem:[%s2900_s19 + $0x78] sm:$0xff] }
 0x14b   : > { %v2677_v20 = vpop.permute.xlu1 %2676 }
 0x14c   : > { %v2672_v42 = vpop.permute.xlu0 %2671  ;;  %v2678_v23 = vunpack.i.l.bf16 %v2677_v20  ;;  %v2679_v13 = vunpack.i.h.bf16 %v2677_v20 }
 0x14d   : > { %v2674_v43 = vunpack.i.h.bf16 %v2672_v42  ;;  %v2673_v11 = vunpack.i.l.bf16 %v2672_v42 }
 0x14e   : > { %v1182_v52 = vsel %vm1167_vm1, %v183_v58, %v2678_v23  ;;  %v1198_v55 = vsel %vm1167_vm1, %v199_v15, %v2679_v13 }
 0x14f   : > { %v2687_v48 = vpop.permute.xlu1 %2686  ;;  %v1280_v4 = vsel %vm1266_vm4, %v1247_v54, %v2673_v11  ;;  %v1296_v36 = vsel %vm1266_vm4, %v1263_v59, %v2674_v43 }
 0x150   : > { %v2682_v51 = vpop.permute.xlu0 %2681  ;;  %v2688_v2 = vunpack.i.l.bf16 %v2687_v48  ;;  %v2689_v16 = vunpack.i.h.bf16 %v2687_v48 }
 0x151   : > { %v2684_v0 = vunpack.i.h.bf16 %v2682_v51  ;;  %v2683_v1 = vunpack.i.l.bf16 %v2682_v51 }
 0x152   : > { %v1215_v14 = vsel %vm1200_vm2, %v1182_v52, %v2688_v2  ;;  %v1231_v34 = vsel %vm1200_vm2, %v1198_v55, %v2689_v16 }
 0x153   : > { %v1130_v62 = vpop.permute.xlu1 %1129  ;;  %v1313_v3 = vsel %vm1299_vm5, %v1280_v4, %v2683_v1  ;;  %v1329_v38 = vsel %vm1299_vm5, %v1296_v36, %v2684_v0 }
 0x154   : > { %v1098_v25 = vpop.permute.xlu0 %1097  ;;  %2224 = vmatprep.mubr.msk.f32.mxu1 %vm1391_vm6, %v1130_v62  ;;  %v1362_v5 = vsel %vm1332_vm7, %v1329_v38, %v1130_v62  ;;  %v3608_v38 = vld [vmem:[%s3821_s2] ss:$0 sm:$0xff] }
 0x155   : > { %2208 = vmatprep.mubr.msk.f32.mxu0 %vm1391_vm6, %v1098_v25  ;;  %v1346_v6 = vsel %vm1332_vm7, %v1313_v3, %v1098_v25  ;;  %1670 = vmatmul.mubr.f32.gmra.mrb[26].mxu1 %v1362_v5 }
 0x156   : > { %1590 = vmatmul.mubr.f32.gmra.mrb[26].mxu0 %v1346_v6 }
 0x157   : > { %v2697_v33 = vpop.permute.xlu1 %2696 }
 0x158   : > { %v2692_v40 = vpop.permute.xlu0 %2691  ;;  %v2698_v8 = vunpack.i.l.bf16 %v2697_v33  ;;  %v2699_v17 = vunpack.i.h.bf16 %v2697_v33 }
 0x159   : > { %v2693_v21 = vunpack.i.l.bf16 %v2692_v40  ;;  %v2694_v47 = vunpack.i.h.bf16 %v2692_v40 }
 0x15b   : > { %v1248_v57 = vsel %vm1233_vm3, %v1215_v14, %v2693_v21  ;;  %v2707_v19 = vpop.permute.xlu1 %2706  ;;  %v1264_v27 = vsel %vm1233_vm3, %v1231_v34, %v2694_v47 }
 0x15c   : > { %v2708_v24 = vunpack.i.l.bf16 %v2707_v19  ;;  %v2702_v18 = vpop.permute.xlu0 %2701  ;;  %v1281_v60 = vsel %vm1266_vm4, %v1248_v57, %v2698_v8  ;;  %v2709_v28 = vunpack.i.h.bf16 %v2707_v19  ;;  %v1297_v32 = vsel %vm1266_vm4, %v1264_v27, %v2699_v17 }
 0x15d   : > { %v2704_v9 = vunpack.i.h.bf16 %v2702_v18  ;;  %v2703_v7 = vunpack.i.l.bf16 %v2702_v18 }
 0x15e   : > { %v1314_v22 = vsel %vm1299_vm5, %v1281_v60, %v2708_v24  ;;  %v1330_v53 = vsel %vm1299_vm5, %v1297_v32, %v2709_v28 }
 0x15f   : > { %v1100_v26 = vpop.permute.xlu1 %1099  ;;  %v1183_v42 = vsel %vm1167_vm1, %v184_v10, %v2703_v7  ;;  %v1199_v49 = vsel %vm1167_vm1, %v200_v50, %v2704_v9 }
 0x160   : > { %v2712_v12 = vpop.permute.xlu0 %2711  ;;  %2209 = vmatprep.mubr.msk.f32.mxu0 %vm1391_vm6, %v1100_v26  ;;  %v1347_v29 = vsel %vm1332_vm7, %v1314_v22, %v1100_v26 }
 0x161   : > { %1595 = vmatmul.mubr.f32.gmra.mrb[28].mxu0 %v1347_v29  ;;  %v2714_v44 = vunpack.i.h.bf16 %v2712_v12  ;;  %v2713_v20 = vunpack.i.l.bf16 %v2712_v12 }
 0x163   : > { %v2717_v30 = vpop.permute.xlu1 %2716  ;;  %v1216_v45 = vsel %vm1200_vm2, %v1183_v42, %v2713_v20  ;;  %v1232_v46 = vsel %vm1200_vm2, %v1199_v49, %v2714_v44 }
 0x164   : > { %v1132_v31 = vpop.permute.xlu0 %1131  ;;  %v2719_v39 = vunpack.i.h.bf16 %v2717_v30  ;;  %v2718_v61 = vunpack.i.l.bf16 %v2717_v30 }
 0x165   : > { %2225 = vmatprep.mubr.msk.f32.mxu1 %vm1391_vm6, %v1132_v31  ;;  %v1363_v37 = vsel %vm1332_vm7, %v1330_v53, %v1132_v31 }
 0x166   : > { %1675 = vmatmul.mubr.f32.gmra.mrb[28].mxu1 %v1363_v37  ;;  %v1249_v63 = vsel %vm1233_vm3, %v1216_v45, %v2718_v61  ;;  %v1265_v51 = vsel %vm1233_vm3, %v1232_v46, %v2719_v39 }
 0x167   : > { %v2727_v41 = vpop.permute.xlu1 %2726 }
 0x168   : > { %v2729_v35 = vunpack.i.h.bf16 %v2727_v41  ;;  %v2728_v43 = vunpack.i.l.bf16 %v2727_v41  ;;  %v2722_v11 = vpop.permute.xlu0 %2721 }
 0x169   : > { %v2724_v48 = vunpack.i.h.bf16 %v2722_v11  ;;  %v2723_v56 = vunpack.i.l.bf16 %v2722_v11 }
 0x16b   : > { %v1134_v54 = vpop.permute.xlu1 %1133  ;;  %v1282_v59 = vsel %vm1266_vm4, %v1249_v63, %v2723_v56  ;;  %v1298_v0 = vsel %vm1266_vm4, %v1265_v51, %v2724_v48 }
 0x16c   : > { %v1102_v1 = vpop.permute.xlu0 %1101  ;;  %2226 = vmatprep.mubr.msk.f32.mxu1 %vm1391_vm6, %v1134_v54  ;;  %v1315_v4 = vsel %vm1299_vm5, %v1282_v59, %v2728_v43  ;;  %v1331_v36 = vsel %vm1299_vm5, %v1298_v0, %v2729_v35 }
 0x16d   : > { %2210 = vmatprep.mubr.msk.f32.mxu0 %vm1391_vm6, %v1102_v1  ;;  %v1348_v62 = vsel %vm1332_vm7, %v1315_v4, %v1102_v1  ;;  %v1364_v3 = vsel %vm1332_vm7, %v1331_v36, %v1134_v54 }
 0x16e   : > { %1600 = vmatmul.mubr.f32.gmra.mrb[30].mxu0 %v1348_v62  ;;  %1680 = vmatmul.mubr.f32.gmra.mrb[30].mxu1 %v1364_v3 }
 0x178   : > { %v1526_v25 = vpop.f32.mrb[0].mxu0 }
 0x179   : > { %v1527_v5 = vadd.f32 %v3608_v38, %v1526_v25  ;;  %v1528_v23 = vpop.f32.mrb[1].mxu0 }
 0x17b   : > { %v1685_v6 = vmax.f32 %v1527_v5, 0.0 }
 0x17d   : > { %1718 = vst.msk [vmem:[#allocation2] sm:$0xff] %vm1717_vm8, %v1685_v6  ;;  %v1606_v58 = vpop.f32.mrb[0].mxu1 }
 0x17e   : > { %v1607_v2 = vadd.f32 %v3608_v38, %v1606_v58  ;;  %v1608_v33 = vpop.f32.mrb[1].mxu1 }
 0x180   : > { %v1701_v40 = vmax.f32 %v1607_v2, 0.0 }
 0x182   : > { %1734 = vst.msk [vmem:[#allocation2 + $0x80] sm:$0xff] %vm1717_vm8, %v1701_v40 }
 0x184   : > { %v1750_v17 = vld [vmem:[#allocation2] sm:$0xff] }
 0x185   : > { %v1531_v52 = vpop.f32.mrb[2].mxu0 }
 0x186   : > { %v1532_v8 = vadd.f32 %v3608_v38, %v1531_v52  ;;  %v1533_v21 = vpop.f32.mrb[3].mxu0 }
 0x188   : > { %v1686_v13 = vmax.f32 %v1532_v8, 0.0 }
 0x189   : > { %v1611_v14 = vpop.f32.mrb[2].mxu1 }
 0x18a   : > { %1719 = vst.msk [vmem:[#allocation2 + $0x8] sm:$0xff] %vm1717_vm8, %v1686_v13  ;;  %v1612_v15 = vadd.f32 %v3608_v38, %v1611_v14  ;;  %v1613_v16 = vpop.f32.mrb[3].mxu1 }
 0x18c   : > { %v1702_v57 = vmax.f32 %v1612_v15, 0.0 }
 0x18e   : > { %1735 = vst.msk [vmem:[#allocation2 + $0x88] sm:$0xff] %vm1717_vm8, %v1702_v57 }
 0x191   : > { %v1751_v50 = vld [vmem:[#allocation2 + $0x8] sm:$0xff] }
 0x195   : > { %v1536_v19 = vpop.f32.mrb[4].mxu0 }
 0x196   : > { %v1537_v47 = vadd.f32 %v3608_v38, %v1536_v19  ;;  %v1616_v24 = vpop.f32.mrb[4].mxu1  ;;  %v1538_v18 = vpop.f32.mrb[5].mxu0 }
 0x197   : > { %v1617_v60 = vadd.f32 %v3608_v38, %v1616_v24  ;;  %v1618_v55 = vpop.f32.mrb[5].mxu1 }
 0x198   : > { %v1687_v22 = vmax.f32 %v1537_v47, 0.0 }
 0x199   : > { %v1703_v34 = vmax.f32 %v1617_v60, 0.0 }
 0x19a   : > { %1720 = vst.msk [vmem:[#allocation2 + $0x10] sm:$0xff] %vm1717_vm8, %v1687_v22 }
 0x19b   : > { %1736 = vst.msk [vmem:[#allocation2 + $0x90] sm:$0xff] %vm1717_vm8, %v1703_v34 }
 0x1a1   : > { %v3622_v26 = vld [vmem:[#allocation2 + $0x10] sm:$0xff]  ;;  %v1541_v27 = vpop.f32.mrb[6].mxu0 }
 0x1a2   : > { %v1783_v28 = vmax.f32 %v1750_v17, %v3622_v26  ;;  %v1542_v12 = vadd.f32 %v3608_v38, %v1541_v27  ;;  %v1621_v29 = vpop.f32.mrb[6].mxu1  ;;  %v1543_v30 = vpop.f32.mrb[7].mxu0  ;;  %v3662_v60 = vld [vmem:[#allocation2 + $0x90] sm:$0xff] }
 0x1a3   : > { %v1622_v32 = vadd.f32 %v3608_v38, %v1621_v29  ;;  %v1623_v9 = vpop.f32.mrb[7].mxu1 }
 0x1a4   : > { %v1799_v7 = vmax.f32 %v1783_v28, 0.0  ;;  %v1688_v31 = vmax.f32 %v1542_v12, 0.0 }
 0x1a5   : > { %v1704_v53 = vmax.f32 %v1622_v32, 0.0 }
 0x1a6   : > { %1815 = vst.msk [vmem:[#allocation3] sm:$0xff] %vm1717_vm8, %v1799_v7  ;;  %1721 = vst.msk [vmem:[#allocation2 + $0x18] sm:$0xff] %vm1717_vm8, %v1688_v31 }
 0x1a7   : > { %1737 = vst.msk [vmem:[#allocation2 + $0x98] sm:$0xff] %vm1717_vm8, %v1704_v53 }
 0x1ac   : > { %v1546_v10 = vpop.f32.mrb[8].mxu0 }
 0x1ad   : > { %v3630_v44 = vld [vmem:[#allocation2 + $0x18] sm:$0xff]  ;;  %v1547_v20 = vadd.f32 %v3608_v38, %v1546_v10  ;;  %v1548_v37 = vpop.f32.mrb[9].mxu0 }
 0x1ae   : > { %v1784_v39 = vmax.f32 %v1751_v50, %v3630_v44  ;;  %v3676_v9 = vld [vmem:[#allocation2 + $0x98] sm:$0xff] }
 0x1af   : > { %v1689_v61 = vmax.f32 %v1547_v20, 0.0 }
 0x1b0   : > { %v1800_v41 = vmax.f32 %v1784_v39, 0.0 }
 0x1b1   : > { %1722 = vst.msk [vmem:[#allocation2 + $0x20] sm:$0xff] %vm1717_vm8, %v1689_v61  ;;  %v1626_v42 = vpop.f32.mrb[8].mxu1 }
 0x1b2   : > { %1816 = vst.msk [vmem:[#allocation3 + $0x8] sm:$0xff] %vm1717_vm8, %v1800_v41  ;;  %v1627_v49 = vadd.f32 %v3608_v38, %v1626_v42  ;;  %v1628_v35 = vpop.f32.mrb[9].mxu1 }
 0x1b4   : > { %v1705_v43 = vmax.f32 %v1627_v49, 0.0 }
 0x1b6   : > { %1738 = vst.msk [vmem:[#allocation2 + $0xa0] sm:$0xff] %vm1717_vm8, %v1705_v43 }
 0x1b8   : > { %v1752_v52 = vld [vmem:[#allocation2 + $0x20] sm:$0xff] }
 0x1b9   : > { %v1551_v11 = vpop.f32.mrb[10].mxu0  ;;  %v1831_v45 = vld [vmem:[#allocation3] ss:$2 sm:$0xff]  ;;  %v1847_v46 = vld [vmem:[#allocation3 + $0x1] ss:$2 sm:$0xff] }
 0x1ba   : > { %v1552_v48 = vadd.f32 %v3608_v38, %v1551_v11  ;;  %v1553_v56 = vpop.f32.mrb[11].mxu0  ;;  %v1870_v63 = vrot.slane %v1847_v46, 7  ;;  %v1895_v51 = vmax.f32 %v1831_v45, %v1847_v46 }
 0x1bc   : > { %v1690_v54 = vmax.f32 %v1552_v48, 0.0  ;;  %v1887_v59 = vsel %vm1886_vm9, 0.0, %v1870_v63 }
 0x1bd   : > { %v1631_v0 = vpop.f32.mrb[10].mxu1  ;;  %v1903_v1 = vmax.f32 %v1895_v51, %v1887_v59  ;;  %v1760_v15 = vld [vmem:[#allocation2 + $0xa0] sm:$0xff] }
 0x1be   : > { %1723 = vst.msk [vmem:[#allocation2 + $0x28] sm:$0xff] %vm1717_vm8, %v1690_v54  ;;  %v1632_v4 = vadd.f32 %v3608_v38, %v1631_v0  ;;  %v1633_v36 = vpop.f32.mrb[11].mxu1 }
 0x1bf   : > { %1911 = vst.msk [vmem:[%s3645_s24] sm:$0xff] %vm1717_vm8, %v1903_v1 }
 0x1c0   : > { %v1706_v62 = vmax.f32 %v1632_v4, 0.0 }
 0x1c2   : > { %1739 = vst.msk [vmem:[#allocation2 + $0xa8] sm:$0xff] %vm1717_vm8, %v1706_v62 }
 0x1c5   : > { %v1753_v12 = vld [vmem:[#allocation2 + $0x28] sm:$0xff] }
 0x1c9   : > { %v1556_v3 = vpop.f32.mrb[12].mxu0  ;;  %v1761_v17 = vld [vmem:[#allocation2 + $0xa8] sm:$0xff] }
 0x1ca   : > { %v1557_v25 = vadd.f32 %v3608_v38, %v1556_v3  ;;  %v1636_v5 = vpop.f32.mrb[12].mxu1  ;;  %v1558_v23 = vpop.f32.mrb[13].mxu0 }
 0x1cb   : > { %v1637_v6 = vadd.f32 %v3608_v38, %v1636_v5  ;;  %v1638_v58 = vpop.f32.mrb[13].mxu1 }
 0x1cc   : > { %v1691_v2 = vmax.f32 %v1557_v25, 0.0 }
 0x1cd   : > { %v1707_v33 = vmax.f32 %v1637_v6, 0.0 }
 0x1ce   : > { %1724 = vst.msk [vmem:[#allocation2 + $0x30] sm:$0xff] %vm1717_vm8, %v1691_v2 }
 0x1cf   : > { %1740 = vst.msk [vmem:[#allocation2 + $0xb0] sm:$0xff] %vm1717_vm8, %v1707_v33 }
 0x1d4   : > { %v1641_v40 = vpop.f32.mrb[14].mxu1 }
 0x1d5   : > { %v3654_v8 = vld [vmem:[#allocation2 + $0x30] sm:$0xff]  ;;  %v1561_v21 = vpop.f32.mrb[14].mxu0  ;;  %v1642_v13 = vadd.f32 %v3608_v38, %v1641_v40  ;;  %v1643_v14 = vpop.f32.mrb[15].mxu1 }
 0x1d6   : > { %v1785_v16 = vmax.f32 %v1752_v52, %v3654_v8  ;;  %v3658_v57 = vld [vmem:[#allocation2 + $0xb0] sm:$0xff]  ;;  %v1562_v19 = vadd.f32 %v3608_v38, %v1561_v21  ;;  %v1563_v47 = vpop.f32.mrb[15].mxu0 }
 0x1d7   : > { %v1793_v24 = vmax.f32 %v1760_v15, %v3658_v57  ;;  %v1708_v18 = vmax.f32 %v1642_v13, 0.0 }
 0x1d8   : > { %v1801_v55 = vmax.f32 %v1785_v16, %v3622_v26  ;;  %v1692_v22 = vmax.f32 %v1562_v19, 0.0 }
 0x1d9   : > { %v1809_v34 = vmax.f32 %v1793_v24, %v3662_v60  ;;  %1741 = vst.msk [vmem:[#allocation2 + $0xb8] sm:$0xff] %vm1717_vm8, %v1708_v18 }
 0x1da   : > { %1817 = vst.msk [vmem:[#allocation3 + $0x10] sm:$0xff] %vm1717_vm8, %v1801_v55  ;;  %1725 = vst.msk [vmem:[#allocation2 + $0x38] sm:$0xff] %vm1717_vm8, %v1692_v22 }
 0x1db   : > { %1825 = vst.msk [vmem:[#allocation3 + $0x50] sm:$0xff] %vm1717_vm8, %v1809_v34 }
 0x1e0   : > { %v3670_v27 = vld [vmem:[#allocation2 + $0xb8] sm:$0xff]  ;;  %v1566_v28 = vpop.f32.mrb[16].mxu0 }
 0x1e1   : > { %v3672_v29 = vld [vmem:[#allocation2 + $0x38] sm:$0xff]  ;;  %v1794_v26 = vmax.f32 %v1761_v17, %v3670_v27  ;;  %v1567_v30 = vadd.f32 %v3608_v38, %v1566_v28  ;;  %v1568_v32 = vpop.f32.mrb[17].mxu0 }
 0x1e2   : > { %v1786_v7 = vmax.f32 %v1753_v12, %v3672_v29 }
 0x1e3   : > { %v1810_v31 = vmax.f32 %v1794_v26, %v3676_v9  ;;  %v1693_v53 = vmax.f32 %v1567_v30, 0.0 }
 0x1e4   : > { %v1802_v10 = vmax.f32 %v1786_v7, %v3630_v44 }
 0x1e5   : > { %1826 = vst.msk [vmem:[#allocation3 + $0x58] sm:$0xff] %vm1717_vm8, %v1810_v31  ;;  %1726 = vst.msk [vmem:[#allocation2 + $0x40] sm:$0xff] %vm1717_vm8, %v1693_v53  ;;  %v1646_v50 = vpop.f32.mrb[16].mxu1 }
 0x1e6   : > { %1818 = vst.msk [vmem:[#allocation3 + $0x18] sm:$0xff] %vm1717_vm8, %v1802_v10  ;;  %v1647_v20 = vadd.f32 %v3608_v38, %v1646_v50  ;;  %v1648_v37 = vpop.f32.mrb[17].mxu1 }
 0x1e8   : > { %v1709_v39 = vmax.f32 %v1647_v20, 0.0 }
 0x1ea   : > { %1742 = vst.msk [vmem:[#allocation2 + $0xc0] sm:$0xff] %vm1717_vm8, %v1709_v39 }
 0x1ec   : > { %v1841_v61 = vld [vmem:[#allocation3 + $0x50] ss:$2 sm:$0xff]  ;;  %v1857_v41 = vld [vmem:[#allocation3 + $0x51] ss:$2 sm:$0xff]  ;;  %v1754_v33 = vld [vmem:[#allocation2 + $0x40] sm:$0xff] }
 0x1ed   : > { %v1833_v42 = vld [vmem:[#allocation3 + $0x10] ss:$2 sm:$0xff]  ;;  %v1849_v49 = vld [vmem:[#allocation3 + $0x11] ss:$2 sm:$0xff]  ;;  %v1875_v35 = vrot.slane %v1857_v41, 7  ;;  %v1900_v44 = vmax.f32 %v1841_v61, %v1857_v41 }
 0x1ee   : > { %v1871_v43 = vrot.slane %v1849_v49, 7  ;;  %v1896_v11 = vmax.f32 %v1833_v42, %v1849_v49 }
 0x1ef   : > { %v1892_v45 = vsel %vm1886_vm9, 0.0, %v1875_v35 }
 0x1f0   : > { %v1651_v46 = vpop.f32.mrb[18].mxu1  ;;  %v1888_v48 = vsel %vm1886_vm9, 0.0, %v1871_v43  ;;  %v1908_v56 = vmax.f32 %v1900_v44, %v1892_v45 }
 0x1f1   : > { %v1571_v63 = vpop.f32.mrb[18].mxu0  ;;  %v1652_v51 = vadd.f32 %v3608_v38, %v1651_v46  ;;  %v1653_v54 = vpop.f32.mrb[19].mxu1  ;;  %v1904_v59 = vmax.f32 %v1896_v11, %v1888_v48  ;;  %v1762_v14 = vld [vmem:[#allocation2 + $0xc0] sm:$0xff] }
 0x1f2   : > { %v1572_v0 = vadd.f32 %v3608_v38, %v1571_v63  ;;  %v1573_v1 = vpop.f32.mrb[19].mxu0  ;;  %1916 = vst.msk [vmem:[%s3645_s24 + $0x28] sm:$0xff] %vm1717_vm8, %v1908_v56 }
 0x1f3   : > { %v1710_v4 = vmax.f32 %v1652_v51, 0.0  ;;  %1912 = vst.msk [vmem:[%s3645_s24 + $0x8] sm:$0xff] %vm1717_vm8, %v1904_v59 }
 0x1f4   : > { %v1694_v36 = vmax.f32 %v1572_v0, 0.0 }
 0x1f5   : > { %1743 = vst.msk [vmem:[#allocation2 + $0xc8] sm:$0xff] %vm1717_vm8, %v1710_v4 }
 0x1f6   : > { %1727 = vst.msk [vmem:[#allocation2 + $0x48] sm:$0xff] %vm1717_vm8, %v1694_v36 }
 0x1fc   : > { %v1576_v62 = vpop.f32.mrb[20].mxu0 }
 0x1fd   : > { %v1577_v3 = vadd.f32 %v3608_v38, %v1576_v62  ;;  %v1578_v25 = vpop.f32.mrb[21].mxu0  ;;  %v1755_v26 = vld [vmem:[#allocation2 + $0x48] sm:$0xff] }
 0x1ff   : > { %v1695_v5 = vmax.f32 %v1577_v3, 0.0 }
 0x201   : > { %1728 = vst.msk [vmem:[#allocation2 + $0x50] sm:$0xff] %vm1717_vm8, %v1695_v5  ;;  %v1656_v23 = vpop.f32.mrb[20].mxu1 }
 0x202   : > { %v1657_v6 = vadd.f32 %v3608_v38, %v1656_v23  ;;  %v1658_v58 = vpop.f32.mrb[21].mxu1 }
 0x204   : > { %v1711_v2 = vmax.f32 %v1657_v6, 0.0 }
 0x206   : > { %1744 = vst.msk [vmem:[#allocation2 + $0xd0] sm:$0xff] %vm1717_vm8, %v1711_v2  ;;  %v1758_v2 = vld [vmem:[#allocation2 + $0x80] sm:$0xff] }
 0x208   : > { %v3700_v40 = vld [vmem:[#allocation2 + $0x50] sm:$0xff] }
 0x209   : > { %v1787_v52 = vmax.f32 %v1754_v33, %v3700_v40  ;;  %v1791_v33 = vmax.f32 %v1758_v2, %v3662_v60 }
 0x20b   : > { %v1803_v21 = vmax.f32 %v1787_v52, %v3654_v8  ;;  %v1763_v8 = vld [vmem:[#allocation2 + $0xc8] sm:$0xff] }
 0x20c   : > { %v1661_v13 = vpop.f32.mrb[22].mxu1 }
 0x20d   : > { %1819 = vst.msk [vmem:[#allocation3 + $0x20] sm:$0xff] %vm1717_vm8, %v1803_v21  ;;  %v3705_v15 = vld [vmem:[#allocation2 + $0xd0] sm:$0xff]  ;;  %v1581_v16 = vpop.f32.mrb[22].mxu0  ;;  %v1662_v19 = vadd.f32 %v3608_v38, %v1661_v13  ;;  %v1663_v47 = vpop.f32.mrb[23].mxu1 }
 0x20e   : > { %v1795_v24 = vmax.f32 %v1762_v14, %v3705_v15  ;;  %v1582_v18 = vadd.f32 %v3608_v38, %v1581_v16  ;;  %v1583_v55 = vpop.f32.mrb[23].mxu0 }
 0x20f   : > { %v1712_v22 = vmax.f32 %v1662_v19, 0.0 }
 0x210   : > { %v1811_v34 = vmax.f32 %v1795_v24, %v3658_v57  ;;  %v1696_v17 = vmax.f32 %v1582_v18, 0.0 }
 0x211   : > { %1745 = vst.msk [vmem:[#allocation2 + $0xd8] sm:$0xff] %vm1717_vm8, %v1712_v22 }
 0x212   : > { %1827 = vst.msk [vmem:[#allocation3 + $0x60] sm:$0xff] %vm1717_vm8, %v1811_v34  ;;  %1729 = vst.msk [vmem:[#allocation2 + $0x58] sm:$0xff] %vm1717_vm8, %v1696_v17 }
 0x218   : > { %v3714_v28 = vld [vmem:[#allocation2 + $0xd8] sm:$0xff]  ;;  %v1586_v12 = vpop.f32.mrb[24].mxu0 }
 0x219   : > { %v3716_v30 = vld [vmem:[#allocation2 + $0x58] sm:$0xff]  ;;  %v1796_v32 = vmax.f32 %v1763_v8, %v3714_v28  ;;  %v1587_v7 = vadd.f32 %v3608_v38, %v1586_v12  ;;  %v1588_v31 = vpop.f32.mrb[25].mxu0 }
 0x21a   : > { %v1788_v57 = vmax.f32 %v1755_v26, %v3716_v30 }
 0x21b   : > { %v1812_v53 = vmax.f32 %v1796_v32, %v3670_v27  ;;  %v1697_v10 = vmax.f32 %v1587_v7, 0.0 }
 0x21c   : > { %v1804_v50 = vmax.f32 %v1788_v57, %v3672_v29 }
 0x21d   : > { %1828 = vst.msk [vmem:[#allocation3 + $0x68] sm:$0xff] %vm1717_vm8, %v1812_v53  ;;  %1730 = vst.msk [vmem:[#allocation2 + $0x60] sm:$0xff] %vm1717_vm8, %v1697_v10  ;;  %v1666_v20 = vpop.f32.mrb[24].mxu1 }
 0x21e   : > { %1820 = vst.msk [vmem:[#allocation3 + $0x28] sm:$0xff] %vm1717_vm8, %v1804_v50  ;;  %v1667_v37 = vadd.f32 %v3608_v38, %v1666_v20  ;;  %v1668_v39 = vpop.f32.mrb[25].mxu1 }
 0x220   : > { %v1713_v61 = vmax.f32 %v1667_v37, 0.0 }
 0x222   : > { %1746 = vst.msk [vmem:[#allocation2 + $0xe0] sm:$0xff] %vm1717_vm8, %v1713_v61 }
 0x224   : > { %v1843_v41 = vld [vmem:[#allocation3 + $0x60] ss:$2 sm:$0xff]  ;;  %v1859_v42 = vld [vmem:[#allocation3 + $0x61] ss:$2 sm:$0xff] }
 0x225   : > { %v1835_v49 = vld [vmem:[#allocation3 + $0x20] ss:$2 sm:$0xff]  ;;  %v1851_v27 = vld [vmem:[#allocation3 + $0x21] ss:$2 sm:$0xff]  ;;  %v1876_v35 = vrot.slane %v1859_v42, 7  ;;  %v1901_v29 = vmax.f32 %v1843_v41, %v1859_v42 }
 0x226   : > { %v1872_v44 = vrot.slane %v1851_v27, 7  ;;  %v1897_v43 = vmax.f32 %v1835_v49, %v1851_v27  ;;  %v1756_v52 = vld [vmem:[#allocation2 + $0x60] sm:$0xff] }
 0x227   : > { %v1893_v11 = vsel %vm1886_vm9, 0.0, %v1876_v35 }
 0x228   : > { %v1671_v45 = vpop.f32.mrb[26].mxu1  ;;  %v1889_v46 = vsel %vm1886_vm9, 0.0, %v1872_v44  ;;  %v1909_v48 = vmax.f32 %v1901_v29, %v1893_v11 }
 0x229   : > { %v1591_v56 = vpop.f32.mrb[26].mxu0  ;;  %v1672_v63 = vadd.f32 %v3608_v38, %v1671_v45  ;;  %v1673_v51 = vpop.f32.mrb[27].mxu1  ;;  %v1905_v54 = vmax.f32 %v1897_v43, %v1889_v46  ;;  %v1764_v8 = vld [vmem:[#allocation2 + $0xe0] sm:$0xff] }
 0x22a   : > { %v1592_v59 = vadd.f32 %v3608_v38, %v1591_v56  ;;  %v1593_v0 = vpop.f32.mrb[27].mxu0  ;;  %1917 = vst.msk [vmem:[%s3645_s24 + $0x30] sm:$0xff] %vm1717_vm8, %v1909_v48 }
 0x22b   : > { %v1714_v1 = vmax.f32 %v1672_v63, 0.0  ;;  %1913 = vst.msk [vmem:[%s3645_s24 + $0x10] sm:$0xff] %vm1717_vm8, %v1905_v54 }
 0x22c   : > { %v1698_v4 = vmax.f32 %v1592_v59, 0.0 }
 0x22d   : > { %1747 = vst.msk [vmem:[#allocation2 + $0xe8] sm:$0xff] %vm1717_vm8, %v1714_v1 }
 0x22e   : > { %1731 = vst.msk [vmem:[#allocation2 + $0x68] sm:$0xff] %vm1717_vm8, %v1698_v4 }
 0x234   : > { %v1596_v36 = vpop.f32.mrb[28].mxu0  ;;  %v1765_v32 = vld [vmem:[#allocation2 + $0xe8] sm:$0xff] }
 0x235   : > { %v1597_v62 = vadd.f32 %v3608_v38, %v1596_v36  ;;  %v1598_v3 = vpop.f32.mrb[29].mxu0  ;;  %v1757_v7 = vld [vmem:[#allocation2 + $0x68] sm:$0xff] }
 0x237   : > { %v1699_v25 = vmax.f32 %v1597_v62, 0.0 }
 0x239   : > { %1732 = vst.msk [vmem:[#allocation2 + $0x70] sm:$0xff] %vm1717_vm8, %v1699_v25  ;;  %v1676_v5 = vpop.f32.mrb[28].mxu1 }
 0x23a   : > { %v1677_v23 = vadd.f32 %v3608_v38, %v1676_v5  ;;  %v1678_v6 = vpop.f32.mrb[29].mxu1 }
 0x23c   : > { %v1715_v58 = vmax.f32 %v1677_v23, 0.0 }
 0x23e   : > { %1748 = vst.msk [vmem:[#allocation2 + $0xf0] sm:$0xff] %vm1717_vm8, %v1715_v58 }
 0x240   : > { %v1773_v21 = vld [vmem:[#allocation2 + $0x70] sm:$0xff] }
 0x241   : > { %v1789_v13 = vmax.f32 %v1756_v52, %v1773_v21  ;;  %v1807_v14 = vmax.f32 %v1791_v33, %v1773_v21  ;;  %v1601_v16 = vpop.f32.mrb[30].mxu0  ;;  %v1681_v19 = vpop.f32.mrb[30].mxu1 }
 0x242   : > { %v1602_v47 = vadd.f32 %v3608_v38, %v1601_v16  ;;  %v1682_v24 = vadd.f32 %v3608_v38, %v1681_v19  ;;  %v1603_v18 = vpop.f32.mrb[31].mxu0  ;;  %v1683_v55 = vpop.f32.mrb[31].mxu1  ;;  %v1759_v38 = vld [vmem:[#allocation2 + $0x88] sm:$0xff] }
 0x243   : > { %v1805_v22 = vmax.f32 %v1789_v13, %v3700_v40  ;;  %1823 = vst.msk [vmem:[#allocation3 + $0x40] sm:$0xff] %vm1717_vm8, %v1807_v14  ;;  %v1792_v40 = vmax.f32 %v1759_v38, %v3676_v9 }
 0x244   : > { %v1700_v34 = vmax.f32 %v1602_v47, 0.0  ;;  %v1716_v17 = vmax.f32 %v1682_v24, 0.0 }
 0x245   : > { %1821 = vst.msk [vmem:[#allocation3 + $0x30] sm:$0xff] %vm1717_vm8, %v1805_v22  ;;  %v1781_v60 = vld [vmem:[#allocation2 + $0xf0] sm:$0xff] }
 0x246   : > { %v1797_v12 = vmax.f32 %v1764_v8, %v1781_v60  ;;  %1733 = vst.msk [vmem:[#allocation2 + $0x78] sm:$0xff] %vm1717_vm8, %v1700_v34  ;;  %1749 = vst.msk [vmem:[#allocation2 + $0xf8] sm:$0xff] %vm1717_vm8, %v1716_v17 }
 0x248   : > { %v1813_v26 = vmax.f32 %v1797_v12, %v3705_v15 }
 0x24a   : > { %1829 = vst.msk [vmem:[#allocation3 + $0x70] sm:$0xff] %vm1717_vm8, %v1813_v26 }
 0x24d   : > { %v1774_v31 = vld [vmem:[#allocation2 + $0x78] sm:$0xff] }
 0x24e   : > { %v1782_v57 = vld [vmem:[#allocation2 + $0xf8] sm:$0xff]  ;;  %v1790_v53 = vmax.f32 %v1757_v7, %v1774_v31  ;;  %v1808_v10 = vmax.f32 %v1792_v40, %v1774_v31 }
 0x24f   : > { %v1798_v50 = vmax.f32 %v1765_v32, %v1782_v57 }
 0x250   : > { %v1806_v20 = vmax.f32 %v1790_v53, %v3716_v30  ;;  %1824 = vst.msk [vmem:[#allocation3 + $0x48] sm:$0xff] %vm1717_vm8, %v1808_v10 }
 0x251   : > { %v1814_v15 = vmax.f32 %v1798_v50, %v3714_v28 }
 0x252   : > { %1822 = vst.msk [vmem:[#allocation3 + $0x38] sm:$0xff] %vm1717_vm8, %v1806_v20 }
 0x253   : > { %1830 = vst.msk [vmem:[#allocation3 + $0x78] sm:$0xff] %vm1717_vm8, %v1814_v15 }
 0x257   : > { %v1839_v9 = vld [vmem:[#allocation3 + $0x40] ss:$2 sm:$0xff]  ;;  %v1855_v37 = vld [vmem:[#allocation3 + $0x41] ss:$2 sm:$0xff] }
 0x258   : > { %v1874_v39 = vrot.slane %v1855_v37, 7  ;;  %v1899_v61 = vmax.f32 %v1839_v9, %v1855_v37 }
 0x259   : > { %v1837_v41 = vld [vmem:[#allocation3 + $0x30] ss:$2 sm:$0xff]  ;;  %v1853_v49 = vld [vmem:[#allocation3 + $0x31] ss:$2 sm:$0xff] }
 0x25a   : > { %v1845_v42 = vld [vmem:[#allocation3 + $0x70] ss:$2 sm:$0xff]  ;;  %v1861_v27 = vld [vmem:[#allocation3 + $0x71] ss:$2 sm:$0xff]  ;;  %v1873_v30 = vrot.slane %v1853_v49, 7  ;;  %v1891_v35 = vsel %vm1886_vm9, 0.0, %v1874_v39  ;;  %v1898_v28 = vmax.f32 %v1837_v41, %v1853_v49 }
 0x25b   : > { %v1877_v29 = vrot.slane %v1861_v27, 7  ;;  %v1902_v44 = vmax.f32 %v1845_v42, %v1861_v27  ;;  %v1907_v43 = vmax.f32 %v1899_v61, %v1891_v35 }
 0x25c   : > { %v1890_v11 = vsel %vm1886_vm9, 0.0, %v1873_v30 }
 0x25d   : > { %v1894_v45 = vsel %vm1886_vm9, 0.0, %v1877_v29  ;;  %v1906_v46 = vmax.f32 %v1898_v28, %v1890_v11  ;;  %1915 = vst.msk [vmem:[%s3645_s24 + $0x20] sm:$0xff] %vm1717_vm8, %v1907_v43 }
 0x25e   : > { %v1910_v48 = vmax.f32 %v1902_v44, %v1894_v45 }
 0x25f   : > { %1914 = vst.msk [vmem:[%s3645_s24 + $0x18] sm:$0xff] %vm1717_vm8, %v1906_v46 }
 0x260   : > { %1918 = vst.msk [vmem:[%s3645_s24 + $0x38] sm:$0xff] %vm1717_vm8, %v1910_v48 }
 0x261   : > { %2743 = shalt.err (!%p2740_p3)
}
 0x262   : > { %s2744_s8 = scalar_lea.hbm %s3768_s30, 1024  ;;  %s2748_s17 = scalar_lea.hbm %s3822_s3, 2048 }
 0x263   : > { %p2745_p4 = scmp.ne.s32.totalorder %s3768_s30, %s2744_s8  ;;  %p2749_p9 = scmp.lt.u32.totalorder %s3768_s30, %s3822_s3 }
 0x264   : > { %p2750_p10 = scmp.lt.u32.totalorder %s2748_s17, %s2744_s8  ;;  %p2752_p12 = scmp.lt.u32.totalorder %s2744_s8, %s3768_s30 }
 0x265   : > { %p2746_p7 = pnand %p2745_p4, %p2863_p5 }
 0x266   : > { %p2751_p11 = por %p2750_p10, %p2749_p9 }
 0x267   : > { %p2747_p8 = pneg %p2746_p7 }
 0x268   : > { %p2753_p13 = por %p2752_p12, %p2751_p11 }
 0x26a   : > { %p2754_p0 = pnand %p2753_p13, %p2747_p8 }
 0x26c   : > { %2757 = shalt.err (!%p2754_p0)
}
 0x26d   : > { %s2803_s9 = smov 128   ;;  %s2804_s20 = smov 8  }
 0x26e   : > { %2281 = dma.vmem_to_hbm [thread:$0]  (%p2863_p5), %s3770_s26, 1024, %s3768_s30, %s3778_s16, %s2803_s9, %s2803_s9, %s2804_s20  }
 0x26f PF: > { %p2287_p1 = scmp.ge.s32.totalorder %s2792_s15, 2  ;;  %s1948_s24 = sand.u32 1, %s2780_s12  }
 0x270   : > { %s1949_s25 = scalar_lea.sflag [#allocation5], %s1948_s24 }
 0x271   : > { %p2284_p2 = pnand %p2287_p1, %p2867_p6 }
 0x273   : > { %2775 = dma.done.wait (!%p2284_p2), %s1949_s25, 1024  }
 0x274   : > { %2777 = vsyncadd (!%p2284_p2), %s1949_s25, 4294966272  ;;  %p13_p3 = scmp.ge.s32.totalorder %s2850_s18, 4   ;;  %s3825_s12 = smov %s2784_s13 }
 0x275   : > { %s3826_s13 = smov %s2788_s14  ;;  %s3827_s14 = smov %s2861_s21 }
 0x276   : > { %s3828_s15 = smov %s2850_s18  ;;  %15 = sbr.rel (!%p13_p3) target bundleno = 3 (0x3), region = 89 }
 0x27d   :  { %1954 = vsyncpa [#allocation5], 1 }
 0x27e   :  { %1956 = vsyncpa [#allocation5 + $0x1], 1 }

</bundles_post_ra>
